<compile_context>
chip_gen: v7x
topology: tpu7x:2x2x1
jax: 0.10.0
libtpu: 0.0.40
codegen_flags: <defaults>
</compile_context>

<pallas_src>
import functools

import jax
import jax.numpy as jnp
from jax import lax
from jax.experimental import pallas as pl
from jax.experimental.pallas import tpu as pltpu


# ----------------------------- Pallas kernel -------------------------------


def seq2seq_kernel(
    seq_ref,        # (L*B, 1) int32 token ids, time-major (row = t*B + b)
    xw_ref,         # (V, 4*He + 4*Hd) fused [src_emb @ enc_wih | tgt_emb @ dec_wih]
    xb_ref,         # (1, 4*He + 4*Hd) fused [enc_b | dec_b]
    enc_whh_ref,    # (He, 4*He)
    e2d_w_ref,      # (He, Hd)
    e2d_b_ref,      # (1, Hd)
    dec_whh_ref,    # (Hd, 4*Hd)
    d2v_w_ref,      # (Hd, V)
    d2v_b_ref,      # (1, V)
    out_ref,        # (L*B, V) float32 logits, time-major
    dec_h_ref,      # (L*B, Hd) VMEM scratch for decoder hidden states
    *,
    batch,
    seq_len,
):
    B, L = batch, seq_len
    V = xw_ref.shape[0]
    He = enc_whh_ref.shape[0]
    Hd = dec_whh_ref.shape[0]
    GE = 4 * He  # lane offset separating encoder / decoder gate projections

    # ---- embedding lookup as one-hot matmul (exact, MXU friendly), fused
    # with both W_ih projections and biases: one matmul instead of 2 + 2*L.
    seq = seq_ref[...]                                              # (L*B, 1)
    iota = lax.broadcasted_iota(jnp.int32, (L * B, V), 1)
    onehot = (iota == seq).astype(jnp.float32)
    x_proj = (
        jnp.dot(onehot, xw_ref[...], preferred_element_type=jnp.float32)
        + xb_ref[...]
    )                                                               # (L*B, 4He+4Hd)

    enc_whh = enc_whh_ref[...]
    dec_whh = dec_whh_ref[...]

    def lstm_step(x_gates, h, c, whh, hidden):
        """PyTorch LSTMCell semantics, gates (i, f, g, o); x-part precomputed."""
        gates = x_gates + jnp.dot(h, whh, preferred_element_type=jnp.float32)
        i_g = jax.nn.sigmoid(gates[:, 0 * hidden:1 * hidden])
        f_g = jax.nn.sigmoid(gates[:, 1 * hidden:2 * hidden])
        g_g = jnp.tanh(gates[:, 2 * hidden:3 * hidden])
        o_g = jax.nn.sigmoid(gates[:, 3 * hidden:4 * hidden])
        c_new = f_g * c + i_g * g_g
        h_new = o_g * jnp.tanh(c_new)
        return h_new, c_new

    # ---- encoder LSTM (num_layers=1, zero initial state) ----
    h = jnp.zeros((B, He), jnp.float32)
    c = jnp.zeros((B, He), jnp.float32)
    for t in range(L):  # L small & static -> fully unrolled
        h, c = lstm_step(x_proj[t * B:(t + 1) * B, :GE], h, c, enc_whh, He)

    # ---- enc2dec bridge: single stacked matmul for both h_T and c_T ----
    hc = jnp.concatenate([h, c], axis=0)                            # (2B, He)
    hc_dec = jnp.tanh(
        jnp.dot(hc, e2d_w_ref[...], preferred_element_type=jnp.float32)
        + e2d_b_ref[...]
    )
    h_d = hc_dec[:B]
    c_d = hc_dec[B:]

    # ---- decoder LSTM over the input-sequence embeddings (as in the module),
    #      hidden states accumulated into a flat VMEM scratch.
    for t in range(L):
        h_d, c_d = lstm_step(x_proj[t * B:(t + 1) * B, GE:], h_d, c_d,
                             dec_whh, Hd)
        dec_h_ref[t * B:(t + 1) * B, :] = h_d

    # ---- vocab projection on the flat (L*B, Hd) slab ----
    out_ref[...] = (
        jnp.dot(dec_h_ref[...], d2v_w_ref[...],
                preferred_element_type=jnp.float32)
        + d2v_b_ref[...]
    )


# ------------------------------- wrapper ------------------------------------


@jax.jit
def seq2seq_forward(in_seq, params):
    B, L = in_seq.shape
    V = params["src_emb"].shape[0]
    He = params["enc_whh"].shape[0]
    Hd = params["dec_whh"].shape[0]
    hp = lax.Precision.HIGHEST

    # Algebraic fusion of embedding tables with the LSTM input weights
    # (exact: the one-hot lookup selects rows of emb @ W_ih). Biases folded.
    enc_xw = jnp.dot(params["src_emb"], params["enc_wih"], precision=hp)  # (V, 4He)
    dec_xw = jnp.dot(params["tgt_emb"], params["dec_wih"], precision=hp)  # (V, 4Hd)
    xw = jnp.concatenate([enc_xw, dec_xw], axis=1)                        # (V, 4He+4Hd)
    xb = jnp.concatenate([params["enc_b"], params["dec_b"]], axis=1)      # (1, 4He+4Hd)

    # Time-major flat token ids: row index = t*B + b.
    seq_tm = in_seq.astype(jnp.int32).T.reshape(L * B, 1)

    kernel = functools.partial(seq2seq_kernel, batch=B, seq_len=L)
    vmem = pl.BlockSpec(memory_space=pltpu.MemorySpace.VMEM)
    kernel_args = (
        seq_tm,
        xw,
        xb,
        params["enc_whh"],
        params["e2d_w"],
        params["e2d_b"],
        params["dec_whh"],
        params["d2v_w"],
        params["d2v_b"],
    )
    logits_tm = pl.pallas_call(
        kernel,
        out_shape=jax.ShapeDtypeStruct((L * B, V), jnp.float32),
        in_specs=[vmem] * len(kernel_args),
        out_specs=vmem,
        scratch_shapes=[pltpu.VMEM((L * B, Hd), jnp.float32)],
    )(*kernel_args)

    # Free layout plumbing outside the kernel: time-major (L*B, V) -> (B, L, V).
    return logits_tm.reshape(L, B, V).transpose(1, 0, 2)


# ------------------------- deterministic param init -------------------------


def make_params(key, vocab_size, src_dim, tgt_dim, enc_hidden, dec_hidden):
    ks = jax.random.split(key, 12)
    u = lambda k, shape, scale: jax.random.uniform(
        k, shape, jnp.float32, minval=-scale, maxval=scale
    )
    ke = 1.0 / jnp.sqrt(enc_hidden).astype(jnp.float32)
    kd = 1.0 / jnp.sqrt(dec_hidden).astype(jnp.float32)
    params = {
        # init_weights(): embeddings ~ U(-1, 1)
        "src_emb": u(ks[0], (vocab_size, src_dim), 1.0),
        "tgt_emb": u(ks[1], (vocab_size, tgt_dim), 1.0),
        # encoder LSTM (weights stored pre-transposed: (in, 4H))
        "enc_wih": u(ks[2], (src_dim, 4 * enc_hidden), ke),
        "enc_whh": u(ks[3], (enc_hidden, 4 * enc_hidden), ke),
        "enc_b": u(ks[4], (1, 4 * enc_hidden), ke)
        + u(ks[5], (1, 4 * enc_hidden), ke),
        # decoder LSTM
        "dec_wih": u(ks[6], (tgt_dim, 4 * dec_hidden), kd),
        "dec_whh": u(ks[7], (dec_hidden, 4 * dec_hidden), kd),
        "dec_b": u(ks[8], (1, 4 * dec_hidden), kd)
        + u(ks[9], (1, 4 * dec_hidden), kd),
        # enc2dec / dec2vocab linears (biases filled with 0 by init_weights())
        "e2d_w": u(ks[10], (enc_hidden, dec_hidden), ke),
        "e2d_b": jnp.zeros((1, dec_hidden), jnp.float32),
        "d2v_w": u(ks[11], (dec_hidden, vocab_size), kd),
        "d2v_b": jnp.zeros((1, vocab_size), jnp.float32),
    }
    return params


# ----------------------------- pure-JAX reference ----------------------------


def reference_forward(in_seq, params):
    hp = lax.Precision.HIGHEST
    B, L = in_seq.shape
    He = params["enc_whh"].shape[0]
    Hd = params["dec_whh"].shape[0]

    src_emb = params["src_emb"][in_seq]
    tgt_emb = params["tgt_emb"][in_seq]

    def cell(x, h, c, wih, whh, b, H):
        g = jnp.dot(x, wih, precision=hp) + jnp.dot(h, whh, precision=hp) + b
        i = jax.nn.sigmoid(g[:, :H])
        f = jax.nn.sigmoid(g[:, H:2 * H])
        gg = jnp.tanh(g[:, 2 * H:3 * H])
        o = jax.nn.sigmoid(g[:, 3 * H:])
        c2 = f * c + i * gg
        return o * jnp.tanh(c2), c2

    h = jnp.zeros((B, He), jnp.float32)
    c = jnp.zeros((B, He), jnp.float32)
    for t in range(L):
        h, c = cell(src_emb[:, t], h, c, params["enc_wih"], params["enc_whh"],
                    params["enc_b"], He)

    hd = jnp.tanh(jnp.dot(h, params["e2d_w"], precision=hp) + params["e2d_b"])
    cd = jnp.tanh(jnp.dot(c, params["e2d_w"], precision=hp) + params["e2d_b"])

    hs = []
    for t in range(L):
        hd, cd = cell(tgt_emb[:, t], hd, cd, params["dec_wih"],
                      params["dec_whh"], params["dec_b"], Hd)
        hs.append(hd[:, None, :])
    tgt_h = jnp.concatenate(hs, axis=1)
    return jnp.dot(tgt_h, params["d2v_w"], precision=hp) + params["d2v_b"]


# ---------------------------------- main -------------------------------------


if __name__ == "__main__":
    vocab_size = 16
    src_word_embedding_dim = 16
    tgt_word_embedding_dim = 16
    enc_hidden_dim = 32
    dec_hidden_dim = 32
    batch_size = 2
    seq_len = 8

    key = jax.random.PRNGKey(0)
    key_seq, key_params = jax.random.split(key)

    in_seq = jax.random.randint(
        key_seq, (batch_size, seq_len), 0, vocab_size, dtype=jnp.int32
    )
    params = make_params(
        key_params,
        vocab_size,
        src_word_embedding_dim,
        tgt_word_embedding_dim,
        enc_hidden_dim,
        dec_hidden_dim,
    )

    logits = seq2seq_forward(in_seq, params)
    logits = jax.block_until_ready(logits)

    ref = jax.block_until_ready(reference_forward(in_seq, params))
    assert logits.shape == (batch_size, seq_len, vocab_size)
    assert jnp.allclose(logits, ref, atol=5e-3, rtol=5e-3)

    print("KERNEL_OK")
</pallas_src>

<mosaic_0001>
module attributes {stable_mosaic.version = 11 : i64} {
  func.func @seq2seq_kernel(%arg0: memref<16x1xi32, #tpu.memory_space<vmem>>, %arg1: memref<16x256xf32, #tpu.memory_space<vmem>>, %arg2: memref<1x256xf32, #tpu.memory_space<vmem>>, %arg3: memref<32x128xf32, #tpu.memory_space<vmem>>, %arg4: memref<32x32xf32, #tpu.memory_space<vmem>>, %arg5: memref<1x32xf32, #tpu.memory_space<vmem>>, %arg6: memref<32x128xf32, #tpu.memory_space<vmem>>, %arg7: memref<32x16xf32, #tpu.memory_space<vmem>>, %arg8: memref<1x16xf32, #tpu.memory_space<vmem>>, %arg9: memref<16x16xf32, #tpu.memory_space<vmem>>, %arg10: memref<16x32xf32, #tpu.memory_space<vmem>>) attributes {dimension_semantics = [], scalar_prefetch = 0 : i64, scratch_operands = 1 : i64, tpu.core_type = #tpu.core_type<tc>} {
    %c0 = arith.constant 0 : index
    %c0_0 = arith.constant 0 : index
    %0 = vector.load %arg0[%c0, %c0_0] : memref<16x1xi32, #tpu.memory_space<vmem>>, vector<16x1xi32>
    %1 = tpu.iota {dimensions = array<i32: 1>} : vector<16x16xi32>
    %2 = vector.broadcast %0 : vector<16x1xi32> to vector<16x16xi32>
    %3 = arith.cmpi eq, %1, %2 : vector<16x16xi32>
    %4 = arith.extui %3 : vector<16x16xi1> to vector<16x16xi32>
    %5 = arith.sitofp %4 : vector<16x16xi32> to vector<16x16xf32>
    %c0_1 = arith.constant 0 : index
    %c0_2 = arith.constant 0 : index
    %6 = vector.load %arg1[%c0_1, %c0_2] : memref<16x256xf32, #tpu.memory_space<vmem>>, vector<16x256xf32>
    %cst = arith.constant dense<0.000000e+00> : vector<16x256xf32>
    %7 = tpu.matmul %5, %6, %cst {dimension_numbers = #tpu.dot_dimension_numbers<[1], [0], [0], [1], [0, 0, 1, 1], [], []>} : vector<16x16xf32>, vector<16x256xf32>, vector<16x256xf32> -> vector<16x256xf32>
    %c0_3 = arith.constant 0 : index
    %c0_4 = arith.constant 0 : index
    %8 = vector.load %arg2[%c0_3, %c0_4] : memref<1x256xf32, #tpu.memory_space<vmem>>, vector<1x256xf32>
    %9 = vector.broadcast %8 : vector<1x256xf32> to vector<16x256xf32>
    %10 = arith.addf %7, %9 : vector<16x256xf32>
    %c0_5 = arith.constant 0 : index
    %c0_6 = arith.constant 0 : index
    %11 = vector.load %arg3[%c0_5, %c0_6] : memref<32x128xf32, #tpu.memory_space<vmem>>, vector<32x128xf32>
    %c0_7 = arith.constant 0 : index
    %c0_8 = arith.constant 0 : index
    %12 = vector.load %arg6[%c0_7, %c0_8] : memref<32x128xf32, #tpu.memory_space<vmem>>, vector<32x128xf32>
    %cst_9 = arith.constant 0.000000e+00 : f32
    %13 = vector.broadcast %cst_9 : f32 to vector<2x32xf32>
    %cst_10 = arith.constant 0.000000e+00 : f32
    %14 = vector.broadcast %cst_10 : f32 to vector<2x32xf32>
    %15 = vector.extract_strided_slice %10 {offsets = [0, 0], sizes = [2, 128], strides = [1, 1]} : vector<16x256xf32> to vector<2x128xf32>
    %cst_11 = arith.constant dense<0.000000e+00> : vector<2x128xf32>
    %16 = tpu.matmul %13, %11, %cst_11 {dimension_numbers = #tpu.dot_dimension_numbers<[1], [0], [0], [1], [0, 0, 1, 1], [], []>} : vector<2x32xf32>, vector<32x128xf32>, vector<2x128xf32> -> vector<2x128xf32>
    %17 = arith.addf %15, %16 : vector<2x128xf32>
    %18 = vector.extract_strided_slice %17 {offsets = [0, 0], sizes = [2, 32], strides = [1, 1]} : vector<2x128xf32> to vector<2x32xf32>
    %19 = arith.negf %18 : vector<2x32xf32>
    %20 = math.exp %19 : vector<2x32xf32>
    %cst_12 = arith.constant 1.000000e+00 : f32
    %21 = vector.broadcast %cst_12 : f32 to vector<2x32xf32>
    %22 = arith.addf %21, %20 : vector<2x32xf32>
    %23 = arith.divf %21, %22 : vector<2x32xf32>
    %24 = vector.extract_strided_slice %17 {offsets = [0, 32], sizes = [2, 32], strides = [1, 1]} : vector<2x128xf32> to vector<2x32xf32>
    %25 = arith.negf %24 : vector<2x32xf32>
    %26 = math.exp %25 : vector<2x32xf32>
    %cst_13 = arith.constant 1.000000e+00 : f32
    %27 = vector.broadcast %cst_13 : f32 to vector<2x32xf32>
    %28 = arith.addf %27, %26 : vector<2x32xf32>
    %29 = arith.divf %27, %28 : vector<2x32xf32>
    %30 = vector.extract_strided_slice %17 {offsets = [0, 64], sizes = [2, 32], strides = [1, 1]} : vector<2x128xf32> to vector<2x32xf32>
    %31 = math.tanh %30 : vector<2x32xf32>
    %32 = vector.extract_strided_slice %17 {offsets = [0, 96], sizes = [2, 32], strides = [1, 1]} : vector<2x128xf32> to vector<2x32xf32>
    %33 = arith.negf %32 : vector<2x32xf32>
    %34 = math.exp %33 : vector<2x32xf32>
    %cst_14 = arith.constant 1.000000e+00 : f32
    %35 = vector.broadcast %cst_14 : f32 to vector<2x32xf32>
    %36 = arith.addf %35, %34 : vector<2x32xf32>
    %37 = arith.divf %35, %36 : vector<2x32xf32>
    %38 = arith.mulf %29, %14 : vector<2x32xf32>
    %39 = arith.mulf %23, %31 : vector<2x32xf32>
    %40 = arith.addf %38, %39 : vector<2x32xf32>
    %41 = math.tanh %40 : vector<2x32xf32>
    %42 = arith.mulf %37, %41 : vector<2x32xf32>
    %43 = vector.extract_strided_slice %10 {offsets = [2, 0], sizes = [2, 128], strides = [1, 1]} : vector<16x256xf32> to vector<2x128xf32>
    %cst_15 = arith.constant dense<0.000000e+00> : vector<2x128xf32>
    %44 = tpu.matmul %42, %11, %cst_15 {dimension_numbers = #tpu.dot_dimension_numbers<[1], [0], [0], [1], [0, 0, 1, 1], [], []>} : vector<2x32xf32>, vector<32x128xf32>, vector<2x128xf32> -> vector<2x128xf32>
    %45 = arith.addf %43, %44 : vector<2x128xf32>
    %46 = vector.extract_strided_slice %45 {offsets = [0, 0], sizes = [2, 32], strides = [1, 1]} : vector<2x128xf32> to vector<2x32xf32>
    %47 = arith.negf %46 : vector<2x32xf32>
    %48 = math.exp %47 : vector<2x32xf32>
    %cst_16 = arith.constant 1.000000e+00 : f32
    %49 = vector.broadcast %cst_16 : f32 to vector<2x32xf32>
    %50 = arith.addf %49, %48 : vector<2x32xf32>
    %51 = arith.divf %49, %50 : vector<2x32xf32>
    %52 = vector.extract_strided_slice %45 {offsets = [0, 32], sizes = [2, 32], strides = [1, 1]} : vector<2x128xf32> to vector<2x32xf32>
    %53 = arith.negf %52 : vector<2x32xf32>
    %54 = math.exp %53 : vector<2x32xf32>
    %cst_17 = arith.constant 1.000000e+00 : f32
    %55 = vector.broadcast %cst_17 : f32 to vector<2x32xf32>
    %56 = arith.addf %55, %54 : vector<2x32xf32>
    %57 = arith.divf %55, %56 : vector<2x32xf32>
    %58 = vector.extract_strided_slice %45 {offsets = [0, 64], sizes = [2, 32], strides = [1, 1]} : vector<2x128xf32> to vector<2x32xf32>
    %59 = math.tanh %58 : vector<2x32xf32>
    %60 = vector.extract_strided_slice %45 {offsets = [0, 96], sizes = [2, 32], strides = [1, 1]} : vector<2x128xf32> to vector<2x32xf32>
    %61 = arith.negf %60 : vector<2x32xf32>
    %62 = math.exp %61 : vector<2x32xf32>
    %cst_18 = arith.constant 1.000000e+00 : f32
    %63 = vector.broadcast %cst_18 : f32 to vector<2x32xf32>
    %64 = arith.addf %63, %62 : vector<2x32xf32>
    %65 = arith.divf %63, %64 : vector<2x32xf32>
    %66 = arith.mulf %57, %40 : vector<2x32xf32>
    %67 = arith.mulf %51, %59 : vector<2x32xf32>
    %68 = arith.addf %66, %67 : vector<2x32xf32>
    %69 = math.tanh %68 : vector<2x32xf32>
    %70 = arith.mulf %65, %69 : vector<2x32xf32>
    %71 = vector.extract_strided_slice %10 {offsets = [4, 0], sizes = [2, 128], strides = [1, 1]} : vector<16x256xf32> to vector<2x128xf32>
    %cst_19 = arith.constant dense<0.000000e+00> : vector<2x128xf32>
    %72 = tpu.matmul %70, %11, %cst_19 {dimension_numbers = #tpu.dot_dimension_numbers<[1], [0], [0], [1], [0, 0, 1, 1], [], []>} : vector<2x32xf32>, vector<32x128xf32>, vector<2x128xf32> -> vector<2x128xf32>
    %73 = arith.addf %71, %72 : vector<2x128xf32>
    %74 = vector.extract_strided_slice %73 {offsets = [0, 0], sizes = [2, 32], strides = [1, 1]} : vector<2x128xf32> to vector<2x32xf32>
    %75 = arith.negf %74 : vector<2x32xf32>
    %76 = math.exp %75 : vector<2x32xf32>
    %cst_20 = arith.constant 1.000000e+00 : f32
    %77 = vector.broadcast %cst_20 : f32 to vector<2x32xf32>
    %78 = arith.addf %77, %76 : vector<2x32xf32>
    %79 = arith.divf %77, %78 : vector<2x32xf32>
    %80 = vector.extract_strided_slice %73 {offsets = [0, 32], sizes = [2, 32], strides = [1, 1]} : vector<2x128xf32> to vector<2x32xf32>
    %81 = arith.negf %80 : vector<2x32xf32>
    %82 = math.exp %81 : vector<2x32xf32>
    %cst_21 = arith.constant 1.000000e+00 : f32
    %83 = vector.broadcast %cst_21 : f32 to vector<2x32xf32>
    %84 = arith.addf %83, %82 : vector<2x32xf32>
    %85 = arith.divf %83, %84 : vector<2x32xf32>
    %86 = vector.extract_strided_slice %73 {offsets = [0, 64], sizes = [2, 32], strides = [1, 1]} : vector<2x128xf32> to vector<2x32xf32>
    %87 = math.tanh %86 : vector<2x32xf32>
    %88 = vector.extract_strided_slice %73 {offsets = [0, 96], sizes = [2, 32], strides = [1, 1]} : vector<2x128xf32> to vector<2x32xf32>
    %89 = arith.negf %88 : vector<2x32xf32>
    %90 = math.exp %89 : vector<2x32xf32>
    %cst_22 = arith.constant 1.000000e+00 : f32
    %91 = vector.broadcast %cst_22 : f32 to vector<2x32xf32>
    %92 = arith.addf %91, %90 : vector<2x32xf32>
    %93 = arith.divf %91, %92 : vector<2x32xf32>
    %94 = arith.mulf %85, %68 : vector<2x32xf32>
    %95 = arith.mulf %79, %87 : vector<2x32xf32>
    %96 = arith.addf %94, %95 : vector<2x32xf32>
    %97 = math.tanh %96 : vector<2x32xf32>
    %98 = arith.mulf %93, %97 : vector<2x32xf32>
    %99 = vector.extract_strided_slice %10 {offsets = [6, 0], sizes = [2, 128], strides = [1, 1]} : vector<16x256xf32> to vector<2x128xf32>
    %cst_23 = arith.constant dense<0.000000e+00> : vector<2x128xf32>
    %100 = tpu.matmul %98, %11, %cst_23 {dimension_numbers = #tpu.dot_dimension_numbers<[1], [0], [0], [1], [0, 0, 1, 1], [], []>} : vector<2x32xf32>, vector<32x128xf32>, vector<2x128xf32> -> vector<2x128xf32>
    %101 = arith.addf %99, %100 : vector<2x128xf32>
    %102 = vector.extract_strided_slice %101 {offsets = [0, 0], sizes = [2, 32], strides = [1, 1]} : vector<2x128xf32> to vector<2x32xf32>
    %103 = arith.negf %102 : vector<2x32xf32>
    %104 = math.exp %103 : vector<2x32xf32>
    %cst_24 = arith.constant 1.000000e+00 : f32
    %105 = vector.broadcast %cst_24 : f32 to vector<2x32xf32>
    %106 = arith.addf %105, %104 : vector<2x32xf32>
    %107 = arith.divf %105, %106 : vector<2x32xf32>
    %108 = vector.extract_strided_slice %101 {offsets = [0, 32], sizes = [2, 32], strides = [1, 1]} : vector<2x128xf32> to vector<2x32xf32>
    %109 = arith.negf %108 : vector<2x32xf32>
    %110 = math.exp %109 : vector<2x32xf32>
    %cst_25 = arith.constant 1.000000e+00 : f32
    %111 = vector.broadcast %cst_25 : f32 to vector<2x32xf32>
    %112 = arith.addf %111, %110 : vector<2x32xf32>
    %113 = arith.divf %111, %112 : vector<2x32xf32>
    %114 = vector.extract_strided_slice %101 {offsets = [0, 64], sizes = [2, 32], strides = [1, 1]} : vector<2x128xf32> to vector<2x32xf32>
    %115 = math.tanh %114 : vector<2x32xf32>
    %116 = vector.extract_strided_slice %101 {offsets = [0, 96], sizes = [2, 32], strides = [1, 1]} : vector<2x128xf32> to vector<2x32xf32>
    %117 = arith.negf %116 : vector<2x32xf32>
    %118 = math.exp %117 : vector<2x32xf32>
    %cst_26 = arith.constant 1.000000e+00 : f32
    %119 = vector.broadcast %cst_26 : f32 to vector<2x32xf32>
    %120 = arith.addf %119, %118 : vector<2x32xf32>
    %121 = arith.divf %119, %120 : vector<2x32xf32>
    %122 = arith.mulf %113, %96 : vector<2x32xf32>
    %123 = arith.mulf %107, %115 : vector<2x32xf32>
    %124 = arith.addf %122, %123 : vector<2x32xf32>
    %125 = math.tanh %124 : vector<2x32xf32>
    %126 = arith.mulf %121, %125 : vector<2x32xf32>
    %127 = vector.extract_strided_slice %10 {offsets = [8, 0], sizes = [2, 128], strides = [1, 1]} : vector<16x256xf32> to vector<2x128xf32>
    %cst_27 = arith.constant dense<0.000000e+00> : vector<2x128xf32>
    %128 = tpu.matmul %126, %11, %cst_27 {dimension_numbers = #tpu.dot_dimension_numbers<[1], [0], [0], [1], [0, 0, 1, 1], [], []>} : vector<2x32xf32>, vector<32x128xf32>, vector<2x128xf32> -> vector<2x128xf32>
    %129 = arith.addf %127, %128 : vector<2x128xf32>
    %130 = vector.extract_strided_slice %129 {offsets = [0, 0], sizes = [2, 32], strides = [1, 1]} : vector<2x128xf32> to vector<2x32xf32>
    %131 = arith.negf %130 : vector<2x32xf32>
    %132 = math.exp %131 : vector<2x32xf32>
    %cst_28 = arith.constant 1.000000e+00 : f32
    %133 = vector.broadcast %cst_28 : f32 to vector<2x32xf32>
    %134 = arith.addf %133, %132 : vector<2x32xf32>
    %135 = arith.divf %133, %134 : vector<2x32xf32>
    %136 = vector.extract_strided_slice %129 {offsets = [0, 32], sizes = [2, 32], strides = [1, 1]} : vector<2x128xf32> to vector<2x32xf32>
    %137 = arith.negf %136 : vector<2x32xf32>
    %138 = math.exp %137 : vector<2x32xf32>
    %cst_29 = arith.constant 1.000000e+00 : f32
    %139 = vector.broadcast %cst_29 : f32 to vector<2x32xf32>
    %140 = arith.addf %139, %138 : vector<2x32xf32>
    %141 = arith.divf %139, %140 : vector<2x32xf32>
    %142 = vector.extract_strided_slice %129 {offsets = [0, 64], sizes = [2, 32], strides = [1, 1]} : vector<2x128xf32> to vector<2x32xf32>
    %143 = math.tanh %142 : vector<2x32xf32>
    %144 = vector.extract_strided_slice %129 {offsets = [0, 96], sizes = [2, 32], strides = [1, 1]} : vector<2x128xf32> to vector<2x32xf32>
    %145 = arith.negf %144 : vector<2x32xf32>
    %146 = math.exp %145 : vector<2x32xf32>
    %cst_30 = arith.constant 1.000000e+00 : f32
    %147 = vector.broadcast %cst_30 : f32 to vector<2x32xf32>
    %148 = arith.addf %147, %146 : vector<2x32xf32>
    %149 = arith.divf %147, %148 : vector<2x32xf32>
    %150 = arith.mulf %141, %124 : vector<2x32xf32>
    %151 = arith.mulf %135, %143 : vector<2x32xf32>
    %152 = arith.addf %150, %151 : vector<2x32xf32>
    %153 = math.tanh %152 : vector<2x32xf32>
    %154 = arith.mulf %149, %153 : vector<2x32xf32>
    %155 = vector.extract_strided_slice %10 {offsets = [10, 0], sizes = [2, 128], strides = [1, 1]} : vector<16x256xf32> to vector<2x128xf32>
    %cst_31 = arith.constant dense<0.000000e+00> : vector<2x128xf32>
    %156 = tpu.matmul %154, %11, %cst_31 {dimension_numbers = #tpu.dot_dimension_numbers<[1], [0], [0], [1], [0, 0, 1, 1], [], []>} : vector<2x32xf32>, vector<32x128xf32>, vector<2x128xf32> -> vector<2x128xf32>
    %157 = arith.addf %155, %156 : vector<2x128xf32>
    %158 = vector.extract_strided_slice %157 {offsets = [0, 0], sizes = [2, 32], strides = [1, 1]} : vector<2x128xf32> to vector<2x32xf32>
    %159 = arith.negf %158 : vector<2x32xf32>
    %160 = math.exp %159 : vector<2x32xf32>
    %cst_32 = arith.constant 1.000000e+00 : f32
    %161 = vector.broadcast %cst_32 : f32 to vector<2x32xf32>
    %162 = arith.addf %161, %160 : vector<2x32xf32>
    %163 = arith.divf %161, %162 : vector<2x32xf32>
    %164 = vector.extract_strided_slice %157 {offsets = [0, 32], sizes = [2, 32], strides = [1, 1]} : vector<2x128xf32> to vector<2x32xf32>
    %165 = arith.negf %164 : vector<2x32xf32>
    %166 = math.exp %165 : vector<2x32xf32>
    %cst_33 = arith.constant 1.000000e+00 : f32
    %167 = vector.broadcast %cst_33 : f32 to vector<2x32xf32>
    %168 = arith.addf %167, %166 : vector<2x32xf32>
    %169 = arith.divf %167, %168 : vector<2x32xf32>
    %170 = vector.extract_strided_slice %157 {offsets = [0, 64], sizes = [2, 32], strides = [1, 1]} : vector<2x128xf32> to vector<2x32xf32>
    %171 = math.tanh %170 : vector<2x32xf32>
    %172 = vector.extract_strided_slice %157 {offsets = [0, 96], sizes = [2, 32], strides = [1, 1]} : vector<2x128xf32> to vector<2x32xf32>
    %173 = arith.negf %172 : vector<2x32xf32>
    %174 = math.exp %173 : vector<2x32xf32>
    %cst_34 = arith.constant 1.000000e+00 : f32
    %175 = vector.broadcast %cst_34 : f32 to vector<2x32xf32>
    %176 = arith.addf %175, %174 : vector<2x32xf32>
    %177 = arith.divf %175, %176 : vector<2x32xf32>
    %178 = arith.mulf %169, %152 : vector<2x32xf32>
    %179 = arith.mulf %163, %171 : vector<2x32xf32>
    %180 = arith.addf %178, %179 : vector<2x32xf32>
    %181 = math.tanh %180 : vector<2x32xf32>
    %182 = arith.mulf %177, %181 : vector<2x32xf32>
    %183 = vector.extract_strided_slice %10 {offsets = [12, 0], sizes = [2, 128], strides = [1, 1]} : vector<16x256xf32> to vector<2x128xf32>
    %cst_35 = arith.constant dense<0.000000e+00> : vector<2x128xf32>
    %184 = tpu.matmul %182, %11, %cst_35 {dimension_numbers = #tpu.dot_dimension_numbers<[1], [0], [0], [1], [0, 0, 1, 1], [], []>} : vector<2x32xf32>, vector<32x128xf32>, vector<2x128xf32> -> vector<2x128xf32>
    %185 = arith.addf %183, %184 : vector<2x128xf32>
    %186 = vector.extract_strided_slice %185 {offsets = [0, 0], sizes = [2, 32], strides = [1, 1]} : vector<2x128xf32> to vector<2x32xf32>
    %187 = arith.negf %186 : vector<2x32xf32>
    %188 = math.exp %187 : vector<2x32xf32>
    %cst_36 = arith.constant 1.000000e+00 : f32
    %189 = vector.broadcast %cst_36 : f32 to vector<2x32xf32>
    %190 = arith.addf %189, %188 : vector<2x32xf32>
    %191 = arith.divf %189, %190 : vector<2x32xf32>
    %192 = vector.extract_strided_slice %185 {offsets = [0, 32], sizes = [2, 32], strides = [1, 1]} : vector<2x128xf32> to vector<2x32xf32>
    %193 = arith.negf %192 : vector<2x32xf32>
    %194 = math.exp %193 : vector<2x32xf32>
    %cst_37 = arith.constant 1.000000e+00 : f32
    %195 = vector.broadcast %cst_37 : f32 to vector<2x32xf32>
    %196 = arith.addf %195, %194 : vector<2x32xf32>
    %197 = arith.divf %195, %196 : vector<2x32xf32>
    %198 = vector.extract_strided_slice %185 {offsets = [0, 64], sizes = [2, 32], strides = [1, 1]} : vector<2x128xf32> to vector<2x32xf32>
    %199 = math.tanh %198 : vector<2x32xf32>
    %200 = vector.extract_strided_slice %185 {offsets = [0, 96], sizes = [2, 32], strides = [1, 1]} : vector<2x128xf32> to vector<2x32xf32>
    %201 = arith.negf %200 : vector<2x32xf32>
    %202 = math.exp %201 : vector<2x32xf32>
    %cst_38 = arith.constant 1.000000e+00 : f32
    %203 = vector.broadcast %cst_38 : f32 to vector<2x32xf32>
    %204 = arith.addf %203, %202 : vector<2x32xf32>
    %205 = arith.divf %203, %204 : vector<2x32xf32>
    %206 = arith.mulf %197, %180 : vector<2x32xf32>
    %207 = arith.mulf %191, %199 : vector<2x32xf32>
    %208 = arith.addf %206, %207 : vector<2x32xf32>
    %209 = math.tanh %208 : vector<2x32xf32>
    %210 = arith.mulf %205, %209 : vector<2x32xf32>
    %211 = vector.extract_strided_slice %10 {offsets = [14, 0], sizes = [2, 128], strides = [1, 1]} : vector<16x256xf32> to vector<2x128xf32>
    %cst_39 = arith.constant dense<0.000000e+00> : vector<2x128xf32>
    %212 = tpu.matmul %210, %11, %cst_39 {dimension_numbers = #tpu.dot_dimension_numbers<[1], [0], [0], [1], [0, 0, 1, 1], [], []>} : vector<2x32xf32>, vector<32x128xf32>, vector<2x128xf32> -> vector<2x128xf32>
    %213 = arith.addf %211, %212 : vector<2x128xf32>
    %214 = vector.extract_strided_slice %213 {offsets = [0, 0], sizes = [2, 32], strides = [1, 1]} : vector<2x128xf32> to vector<2x32xf32>
    %215 = arith.negf %214 : vector<2x32xf32>
    %216 = math.exp %215 : vector<2x32xf32>
    %cst_40 = arith.constant 1.000000e+00 : f32
    %217 = vector.broadcast %cst_40 : f32 to vector<2x32xf32>
    %218 = arith.addf %217, %216 : vector<2x32xf32>
    %219 = arith.divf %217, %218 : vector<2x32xf32>
    %220 = vector.extract_strided_slice %213 {offsets = [0, 32], sizes = [2, 32], strides = [1, 1]} : vector<2x128xf32> to vector<2x32xf32>
    %221 = arith.negf %220 : vector<2x32xf32>
    %222 = math.exp %221 : vector<2x32xf32>
    %cst_41 = arith.constant 1.000000e+00 : f32
    %223 = vector.broadcast %cst_41 : f32 to vector<2x32xf32>
    %224 = arith.addf %223, %222 : vector<2x32xf32>
    %225 = arith.divf %223, %224 : vector<2x32xf32>
    %226 = vector.extract_strided_slice %213 {offsets = [0, 64], sizes = [2, 32], strides = [1, 1]} : vector<2x128xf32> to vector<2x32xf32>
    %227 = math.tanh %226 : vector<2x32xf32>
    %228 = vector.extract_strided_slice %213 {offsets = [0, 96], sizes = [2, 32], strides = [1, 1]} : vector<2x128xf32> to vector<2x32xf32>
    %229 = arith.negf %228 : vector<2x32xf32>
    %230 = math.exp %229 : vector<2x32xf32>
    %cst_42 = arith.constant 1.000000e+00 : f32
    %231 = vector.broadcast %cst_42 : f32 to vector<2x32xf32>
    %232 = arith.addf %231, %230 : vector<2x32xf32>
    %233 = arith.divf %231, %232 : vector<2x32xf32>
    %234 = arith.mulf %225, %208 : vector<2x32xf32>
    %235 = arith.mulf %219, %227 : vector<2x32xf32>
    %236 = arith.addf %234, %235 : vector<2x32xf32>
    %237 = math.tanh %236 : vector<2x32xf32>
    %238 = arith.mulf %233, %237 : vector<2x32xf32>
    %239 = tpu.concatenate %238, %236 in 0 : vector<2x32xf32>, vector<2x32xf32> -> vector<4x32xf32>
    %c0_43 = arith.constant 0 : index
    %c0_44 = arith.constant 0 : index
    %240 = vector.load %arg4[%c0_43, %c0_44] : memref<32x32xf32, #tpu.memory_space<vmem>>, vector<32x32xf32>
    %cst_45 = arith.constant dense<0.000000e+00> : vector<4x32xf32>
    %241 = tpu.matmul %239, %240, %cst_45 {dimension_numbers = #tpu.dot_dimension_numbers<[1], [0], [0], [1], [0, 0, 1, 1], [], []>} : vector<4x32xf32>, vector<32x32xf32>, vector<4x32xf32> -> vector<4x32xf32>
    %c0_46 = arith.constant 0 : index
    %c0_47 = arith.constant 0 : index
    %242 = vector.load %arg5[%c0_46, %c0_47] : memref<1x32xf32, #tpu.memory_space<vmem>>, vector<1x32xf32>
    %243 = vector.broadcast %242 : vector<1x32xf32> to vector<4x32xf32>
    %244 = arith.addf %241, %243 : vector<4x32xf32>
    %245 = math.tanh %244 : vector<4x32xf32>
    %246 = vector.extract_strided_slice %245 {offsets = [0, 0], sizes = [2, 32], strides = [1, 1]} : vector<4x32xf32> to vector<2x32xf32>
    %247 = vector.extract_strided_slice %245 {offsets = [2, 0], sizes = [2, 32], strides = [1, 1]} : vector<4x32xf32> to vector<2x32xf32>
    %248 = vector.extract_strided_slice %10 {offsets = [0, 128], sizes = [2, 128], strides = [1, 1]} : vector<16x256xf32> to vector<2x128xf32>
    %cst_48 = arith.constant dense<0.000000e+00> : vector<2x128xf32>
    %249 = tpu.matmul %246, %12, %cst_48 {dimension_numbers = #tpu.dot_dimension_numbers<[1], [0], [0], [1], [0, 0, 1, 1], [], []>} : vector<2x32xf32>, vector<32x128xf32>, vector<2x128xf32> -> vector<2x128xf32>
    %250 = arith.addf %248, %249 : vector<2x128xf32>
    %251 = vector.extract_strided_slice %250 {offsets = [0, 0], sizes = [2, 32], strides = [1, 1]} : vector<2x128xf32> to vector<2x32xf32>
    %252 = arith.negf %251 : vector<2x32xf32>
    %253 = math.exp %252 : vector<2x32xf32>
    %cst_49 = arith.constant 1.000000e+00 : f32
    %254 = vector.broadcast %cst_49 : f32 to vector<2x32xf32>
    %255 = arith.addf %254, %253 : vector<2x32xf32>
    %256 = arith.divf %254, %255 : vector<2x32xf32>
    %257 = vector.extract_strided_slice %250 {offsets = [0, 32], sizes = [2, 32], strides = [1, 1]} : vector<2x128xf32> to vector<2x32xf32>
    %258 = arith.negf %257 : vector<2x32xf32>
    %259 = math.exp %258 : vector<2x32xf32>
    %cst_50 = arith.constant 1.000000e+00 : f32
    %260 = vector.broadcast %cst_50 : f32 to vector<2x32xf32>
    %261 = arith.addf %260, %259 : vector<2x32xf32>
    %262 = arith.divf %260, %261 : vector<2x32xf32>
    %263 = vector.extract_strided_slice %250 {offsets = [0, 64], sizes = [2, 32], strides = [1, 1]} : vector<2x128xf32> to vector<2x32xf32>
    %264 = math.tanh %263 : vector<2x32xf32>
    %265 = vector.extract_strided_slice %250 {offsets = [0, 96], sizes = [2, 32], strides = [1, 1]} : vector<2x128xf32> to vector<2x32xf32>
    %266 = arith.negf %265 : vector<2x32xf32>
    %267 = math.exp %266 : vector<2x32xf32>
    %cst_51 = arith.constant 1.000000e+00 : f32
    %268 = vector.broadcast %cst_51 : f32 to vector<2x32xf32>
    %269 = arith.addf %268, %267 : vector<2x32xf32>
    %270 = arith.divf %268, %269 : vector<2x32xf32>
    %271 = arith.mulf %262, %247 : vector<2x32xf32>
    %272 = arith.mulf %256, %264 : vector<2x32xf32>
    %273 = arith.addf %271, %272 : vector<2x32xf32>
    %274 = math.tanh %273 : vector<2x32xf32>
    %275 = arith.mulf %270, %274 : vector<2x32xf32>
    %c0_52 = arith.constant 0 : index
    %c0_53 = arith.constant 0 : index
    %276 = vector.load %arg10[%c0_52, %c0_53] : memref<16x32xf32, #tpu.memory_space<vmem>>, vector<2x32xf32>
    tpu.vector_store %arg10[%c0_52, %c0_53], %275 {strides = array<i32>} : memref<16x32xf32, #tpu.memory_space<vmem>>, vector<2x32xf32>,
    %277 = vector.extract_strided_slice %10 {offsets = [2, 128], sizes = [2, 128], strides = [1, 1]} : vector<16x256xf32> to vector<2x128xf32>
    %cst_54 = arith.constant dense<0.000000e+00> : vector<2x128xf32>
    %278 = tpu.matmul %275, %12, %cst_54 {dimension_numbers = #tpu.dot_dimension_numbers<[1], [0], [0], [1], [0, 0, 1, 1], [], []>} : vector<2x32xf32>, vector<32x128xf32>, vector<2x128xf32> -> vector<2x128xf32>
    %279 = arith.addf %277, %278 : vector<2x128xf32>
    %280 = vector.extract_strided_slice %279 {offsets = [0, 0], sizes = [2, 32], strides = [1, 1]} : vector<2x128xf32> to vector<2x32xf32>
    %281 = arith.negf %280 : vector<2x32xf32>
    %282 = math.exp %281 : vector<2x32xf32>
    %cst_55 = arith.constant 1.000000e+00 : f32
    %283 = vector.broadcast %cst_55 : f32 to vector<2x32xf32>
    %284 = arith.addf %283, %282 : vector<2x32xf32>
    %285 = arith.divf %283, %284 : vector<2x32xf32>
    %286 = vector.extract_strided_slice %279 {offsets = [0, 32], sizes = [2, 32], strides = [1, 1]} : vector<2x128xf32> to vector<2x32xf32>
    %287 = arith.negf %286 : vector<2x32xf32>
    %288 = math.exp %287 : vector<2x32xf32>
    %cst_56 = arith.constant 1.000000e+00 : f32
    %289 = vector.broadcast %cst_56 : f32 to vector<2x32xf32>
    %290 = arith.addf %289, %288 : vector<2x32xf32>
    %291 = arith.divf %289, %290 : vector<2x32xf32>
    %292 = vector.extract_strided_slice %279 {offsets = [0, 64], sizes = [2, 32], strides = [1, 1]} : vector<2x128xf32> to vector<2x32xf32>
    %293 = math.tanh %292 : vector<2x32xf32>
    %294 = vector.extract_strided_slice %279 {offsets = [0, 96], sizes = [2, 32], strides = [1, 1]} : vector<2x128xf32> to vector<2x32xf32>
    %295 = arith.negf %294 : vector<2x32xf32>
    %296 = math.exp %295 : vector<2x32xf32>
    %cst_57 = arith.constant 1.000000e+00 : f32
    %297 = vector.broadcast %cst_57 : f32 to vector<2x32xf32>
    %298 = arith.addf %297, %296 : vector<2x32xf32>
    %299 = arith.divf %297, %298 : vector<2x32xf32>
    %300 = arith.mulf %291, %273 : vector<2x32xf32>
    %301 = arith.mulf %285, %293 : vector<2x32xf32>
    %302 = arith.addf %300, %301 : vector<2x32xf32>
    %303 = math.tanh %302 : vector<2x32xf32>
    %304 = arith.mulf %299, %303 : vector<2x32xf32>
    %c2 = arith.constant 2 : index
    %c0_58 = arith.constant 0 : index
    %305 = vector.load %arg10[%c2, %c0_58] : memref<16x32xf32, #tpu.memory_space<vmem>>, vector<2x32xf32>
    tpu.vector_store %arg10[%c2, %c0_58], %304 {strides = array<i32>} : memref<16x32xf32, #tpu.memory_space<vmem>>, vector<2x32xf32>,
    %306 = vector.extract_strided_slice %10 {offsets = [4, 128], sizes = [2, 128], strides = [1, 1]} : vector<16x256xf32> to vector<2x128xf32>
    %cst_59 = arith.constant dense<0.000000e+00> : vector<2x128xf32>
    %307 = tpu.matmul %304, %12, %cst_59 {dimension_numbers = #tpu.dot_dimension_numbers<[1], [0], [0], [1], [0, 0, 1, 1], [], []>} : vector<2x32xf32>, vector<32x128xf32>, vector<2x128xf32> -> vector<2x128xf32>
    %308 = arith.addf %306, %307 : vector<2x128xf32>
    %309 = vector.extract_strided_slice %308 {offsets = [0, 0], sizes = [2, 32], strides = [1, 1]} : vector<2x128xf32> to vector<2x32xf32>
    %310 = arith.negf %309 : vector<2x32xf32>
    %311 = math.exp %310 : vector<2x32xf32>
    %cst_60 = arith.constant 1.000000e+00 : f32
    %312 = vector.broadcast %cst_60 : f32 to vector<2x32xf32>
    %313 = arith.addf %312, %311 : vector<2x32xf32>
    %314 = arith.divf %312, %313 : vector<2x32xf32>
    %315 = vector.extract_strided_slice %308 {offsets = [0, 32], sizes = [2, 32], strides = [1, 1]} : vector<2x128xf32> to vector<2x32xf32>
    %316 = arith.negf %315 : vector<2x32xf32>
    %317 = math.exp %316 : vector<2x32xf32>
    %cst_61 = arith.constant 1.000000e+00 : f32
    %318 = vector.broadcast %cst_61 : f32 to vector<2x32xf32>
    %319 = arith.addf %318, %317 : vector<2x32xf32>
    %320 = arith.divf %318, %319 : vector<2x32xf32>
    %321 = vector.extract_strided_slice %308 {offsets = [0, 64], sizes = [2, 32], strides = [1, 1]} : vector<2x128xf32> to vector<2x32xf32>
    %322 = math.tanh %321 : vector<2x32xf32>
    %323 = vector.extract_strided_slice %308 {offsets = [0, 96], sizes = [2, 32], strides = [1, 1]} : vector<2x128xf32> to vector<2x32xf32>
    %324 = arith.negf %323 : vector<2x32xf32>
    %325 = math.exp %324 : vector<2x32xf32>
    %cst_62 = arith.constant 1.000000e+00 : f32
    %326 = vector.broadcast %cst_62 : f32 to vector<2x32xf32>
    %327 = arith.addf %326, %325 : vector<2x32xf32>
    %328 = arith.divf %326, %327 : vector<2x32xf32>
    %329 = arith.mulf %320, %302 : vector<2x32xf32>
    %330 = arith.mulf %314, %322 : vector<2x32xf32>
    %331 = arith.addf %329, %330 : vector<2x32xf32>
    %332 = math.tanh %331 : vector<2x32xf32>
    %333 = arith.mulf %328, %332 : vector<2x32xf32>
    %c4 = arith.constant 4 : index
    %c0_63 = arith.constant 0 : index
    %334 = vector.load %arg10[%c4, %c0_63] : memref<16x32xf32, #tpu.memory_space<vmem>>, vector<2x32xf32>
    tpu.vector_store %arg10[%c4, %c0_63], %333 {strides = array<i32>} : memref<16x32xf32, #tpu.memory_space<vmem>>, vector<2x32xf32>,
    %335 = vector.extract_strided_slice %10 {offsets = [6, 128], sizes = [2, 128], strides = [1, 1]} : vector<16x256xf32> to vector<2x128xf32>
    %cst_64 = arith.constant dense<0.000000e+00> : vector<2x128xf32>
    %336 = tpu.matmul %333, %12, %cst_64 {dimension_numbers = #tpu.dot_dimension_numbers<[1], [0], [0], [1], [0, 0, 1, 1], [], []>} : vector<2x32xf32>, vector<32x128xf32>, vector<2x128xf32> -> vector<2x128xf32>
    %337 = arith.addf %335, %336 : vector<2x128xf32>
    %338 = vector.extract_strided_slice %337 {offsets = [0, 0], sizes = [2, 32], strides = [1, 1]} : vector<2x128xf32> to vector<2x32xf32>
    %339 = arith.negf %338 : vector<2x32xf32>
    %340 = math.exp %339 : vector<2x32xf32>
    %cst_65 = arith.constant 1.000000e+00 : f32
    %341 = vector.broadcast %cst_65 : f32 to vector<2x32xf32>
    %342 = arith.addf %341, %340 : vector<2x32xf32>
    %343 = arith.divf %341, %342 : vector<2x32xf32>
    %344 = vector.extract_strided_slice %337 {offsets = [0, 32], sizes = [2, 32], strides = [1, 1]} : vector<2x128xf32> to vector<2x32xf32>
    %345 = arith.negf %344 : vector<2x32xf32>
    %346 = math.exp %345 : vector<2x32xf32>
    %cst_66 = arith.constant 1.000000e+00 : f32
    %347 = vector.broadcast %cst_66 : f32 to vector<2x32xf32>
    %348 = arith.addf %347, %346 : vector<2x32xf32>
    %349 = arith.divf %347, %348 : vector<2x32xf32>
    %350 = vector.extract_strided_slice %337 {offsets = [0, 64], sizes = [2, 32], strides = [1, 1]} : vector<2x128xf32> to vector<2x32xf32>
    %351 = math.tanh %350 : vector<2x32xf32>
    %352 = vector.extract_strided_slice %337 {offsets = [0, 96], sizes = [2, 32], strides = [1, 1]} : vector<2x128xf32> to vector<2x32xf32>
    %353 = arith.negf %352 : vector<2x32xf32>
    %354 = math.exp %353 : vector<2x32xf32>
    %cst_67 = arith.constant 1.000000e+00 : f32
    %355 = vector.broadcast %cst_67 : f32 to vector<2x32xf32>
    %356 = arith.addf %355, %354 : vector<2x32xf32>
    %357 = arith.divf %355, %356 : vector<2x32xf32>
    %358 = arith.mulf %349, %331 : vector<2x32xf32>
    %359 = arith.mulf %343, %351 : vector<2x32xf32>
    %360 = arith.addf %358, %359 : vector<2x32xf32>
    %361 = math.tanh %360 : vector<2x32xf32>
    %362 = arith.mulf %357, %361 : vector<2x32xf32>
    %c6 = arith.constant 6 : index
    %c0_68 = arith.constant 0 : index
    %363 = vector.load %arg10[%c6, %c0_68] : memref<16x32xf32, #tpu.memory_space<vmem>>, vector<2x32xf32>
    tpu.vector_store %arg10[%c6, %c0_68], %362 {strides = array<i32>} : memref<16x32xf32, #tpu.memory_space<vmem>>, vector<2x32xf32>,
    %364 = vector.extract_strided_slice %10 {offsets = [8, 128], sizes = [2, 128], strides = [1, 1]} : vector<16x256xf32> to vector<2x128xf32>
    %cst_69 = arith.constant dense<0.000000e+00> : vector<2x128xf32>
    %365 = tpu.matmul %362, %12, %cst_69 {dimension_numbers = #tpu.dot_dimension_numbers<[1], [0], [0], [1], [0, 0, 1, 1], [], []>} : vector<2x32xf32>, vector<32x128xf32>, vector<2x128xf32> -> vector<2x128xf32>
    %366 = arith.addf %364, %365 : vector<2x128xf32>
    %367 = vector.extract_strided_slice %366 {offsets = [0, 0], sizes = [2, 32], strides = [1, 1]} : vector<2x128xf32> to vector<2x32xf32>
    %368 = arith.negf %367 : vector<2x32xf32>
    %369 = math.exp %368 : vector<2x32xf32>
    %cst_70 = arith.constant 1.000000e+00 : f32
    %370 = vector.broadcast %cst_70 : f32 to vector<2x32xf32>
    %371 = arith.addf %370, %369 : vector<2x32xf32>
    %372 = arith.divf %370, %371 : vector<2x32xf32>
    %373 = vector.extract_strided_slice %366 {offsets = [0, 32], sizes = [2, 32], strides = [1, 1]} : vector<2x128xf32> to vector<2x32xf32>
    %374 = arith.negf %373 : vector<2x32xf32>
    %375 = math.exp %374 : vector<2x32xf32>
    %cst_71 = arith.constant 1.000000e+00 : f32
    %376 = vector.broadcast %cst_71 : f32 to vector<2x32xf32>
    %377 = arith.addf %376, %375 : vector<2x32xf32>
    %378 = arith.divf %376, %377 : vector<2x32xf32>
    %379 = vector.extract_strided_slice %366 {offsets = [0, 64], sizes = [2, 32], strides = [1, 1]} : vector<2x128xf32> to vector<2x32xf32>
    %380 = math.tanh %379 : vector<2x32xf32>
    %381 = vector.extract_strided_slice %366 {offsets = [0, 96], sizes = [2, 32], strides = [1, 1]} : vector<2x128xf32> to vector<2x32xf32>
    %382 = arith.negf %381 : vector<2x32xf32>
    %383 = math.exp %382 : vector<2x32xf32>
    %cst_72 = arith.constant 1.000000e+00 : f32
    %384 = vector.broadcast %cst_72 : f32 to vector<2x32xf32>
    %385 = arith.addf %384, %383 : vector<2x32xf32>
    %386 = arith.divf %384, %385 : vector<2x32xf32>
    %387 = arith.mulf %378, %360 : vector<2x32xf32>
    %388 = arith.mulf %372, %380 : vector<2x32xf32>
    %389 = arith.addf %387, %388 : vector<2x32xf32>
    %390 = math.tanh %389 : vector<2x32xf32>
    %391 = arith.mulf %386, %390 : vector<2x32xf32>
    %c8 = arith.constant 8 : index
    %c0_73 = arith.constant 0 : index
    %392 = vector.load %arg10[%c8, %c0_73] : memref<16x32xf32, #tpu.memory_space<vmem>>, vector<2x32xf32>
    tpu.vector_store %arg10[%c8, %c0_73], %391 {strides = array<i32>} : memref<16x32xf32, #tpu.memory_space<vmem>>, vector<2x32xf32>,
    %393 = vector.extract_strided_slice %10 {offsets = [10, 128], sizes = [2, 128], strides = [1, 1]} : vector<16x256xf32> to vector<2x128xf32>
    %cst_74 = arith.constant dense<0.000000e+00> : vector<2x128xf32>
    %394 = tpu.matmul %391, %12, %cst_74 {dimension_numbers = #tpu.dot_dimension_numbers<[1], [0], [0], [1], [0, 0, 1, 1], [], []>} : vector<2x32xf32>, vector<32x128xf32>, vector<2x128xf32> -> vector<2x128xf32>
    %395 = arith.addf %393, %394 : vector<2x128xf32>
    %396 = vector.extract_strided_slice %395 {offsets = [0, 0], sizes = [2, 32], strides = [1, 1]} : vector<2x128xf32> to vector<2x32xf32>
    %397 = arith.negf %396 : vector<2x32xf32>
    %398 = math.exp %397 : vector<2x32xf32>
    %cst_75 = arith.constant 1.000000e+00 : f32
    %399 = vector.broadcast %cst_75 : f32 to vector<2x32xf32>
    %400 = arith.addf %399, %398 : vector<2x32xf32>
    %401 = arith.divf %399, %400 : vector<2x32xf32>
    %402 = vector.extract_strided_slice %395 {offsets = [0, 32], sizes = [2, 32], strides = [1, 1]} : vector<2x128xf32> to vector<2x32xf32>
    %403 = arith.negf %402 : vector<2x32xf32>
    %404 = math.exp %403 : vector<2x32xf32>
    %cst_76 = arith.constant 1.000000e+00 : f32
    %405 = vector.broadcast %cst_76 : f32 to vector<2x32xf32>
    %406 = arith.addf %405, %404 : vector<2x32xf32>
    %407 = arith.divf %405, %406 : vector<2x32xf32>
    %408 = vector.extract_strided_slice %395 {offsets = [0, 64], sizes = [2, 32], strides = [1, 1]} : vector<2x128xf32> to vector<2x32xf32>
    %409 = math.tanh %408 : vector<2x32xf32>
    %410 = vector.extract_strided_slice %395 {offsets = [0, 96], sizes = [2, 32], strides = [1, 1]} : vector<2x128xf32> to vector<2x32xf32>
    %411 = arith.negf %410 : vector<2x32xf32>
    %412 = math.exp %411 : vector<2x32xf32>
    %cst_77 = arith.constant 1.000000e+00 : f32
    %413 = vector.broadcast %cst_77 : f32 to vector<2x32xf32>
    %414 = arith.addf %413, %412 : vector<2x32xf32>
    %415 = arith.divf %413, %414 : vector<2x32xf32>
    %416 = arith.mulf %407, %389 : vector<2x32xf32>
    %417 = arith.mulf %401, %409 : vector<2x32xf32>
    %418 = arith.addf %416, %417 : vector<2x32xf32>
    %419 = math.tanh %418 : vector<2x32xf32>
    %420 = arith.mulf %415, %419 : vector<2x32xf32>
    %c10 = arith.constant 10 : index
    %c0_78 = arith.constant 0 : index
    %421 = vector.load %arg10[%c10, %c0_78] : memref<16x32xf32, #tpu.memory_space<vmem>>, vector<2x32xf32>
    tpu.vector_store %arg10[%c10, %c0_78], %420 {strides = array<i32>} : memref<16x32xf32, #tpu.memory_space<vmem>>, vector<2x32xf32>,
    %422 = vector.extract_strided_slice %10 {offsets = [12, 128], sizes = [2, 128], strides = [1, 1]} : vector<16x256xf32> to vector<2x128xf32>
    %cst_79 = arith.constant dense<0.000000e+00> : vector<2x128xf32>
    %423 = tpu.matmul %420, %12, %cst_79 {dimension_numbers = #tpu.dot_dimension_numbers<[1], [0], [0], [1], [0, 0, 1, 1], [], []>} : vector<2x32xf32>, vector<32x128xf32>, vector<2x128xf32> -> vector<2x128xf32>
    %424 = arith.addf %422, %423 : vector<2x128xf32>
    %425 = vector.extract_strided_slice %424 {offsets = [0, 0], sizes = [2, 32], strides = [1, 1]} : vector<2x128xf32> to vector<2x32xf32>
    %426 = arith.negf %425 : vector<2x32xf32>
    %427 = math.exp %426 : vector<2x32xf32>
    %cst_80 = arith.constant 1.000000e+00 : f32
    %428 = vector.broadcast %cst_80 : f32 to vector<2x32xf32>
    %429 = arith.addf %428, %427 : vector<2x32xf32>
    %430 = arith.divf %428, %429 : vector<2x32xf32>
    %431 = vector.extract_strided_slice %424 {offsets = [0, 32], sizes = [2, 32], strides = [1, 1]} : vector<2x128xf32> to vector<2x32xf32>
    %432 = arith.negf %431 : vector<2x32xf32>
    %433 = math.exp %432 : vector<2x32xf32>
    %cst_81 = arith.constant 1.000000e+00 : f32
    %434 = vector.broadcast %cst_81 : f32 to vector<2x32xf32>
    %435 = arith.addf %434, %433 : vector<2x32xf32>
    %436 = arith.divf %434, %435 : vector<2x32xf32>
    %437 = vector.extract_strided_slice %424 {offsets = [0, 64], sizes = [2, 32], strides = [1, 1]} : vector<2x128xf32> to vector<2x32xf32>
    %438 = math.tanh %437 : vector<2x32xf32>
    %439 = vector.extract_strided_slice %424 {offsets = [0, 96], sizes = [2, 32], strides = [1, 1]} : vector<2x128xf32> to vector<2x32xf32>
    %440 = arith.negf %439 : vector<2x32xf32>
    %441 = math.exp %440 : vector<2x32xf32>
    %cst_82 = arith.constant 1.000000e+00 : f32
    %442 = vector.broadcast %cst_82 : f32 to vector<2x32xf32>
    %443 = arith.addf %442, %441 : vector<2x32xf32>
    %444 = arith.divf %442, %443 : vector<2x32xf32>
    %445 = arith.mulf %436, %418 : vector<2x32xf32>
    %446 = arith.mulf %430, %438 : vector<2x32xf32>
    %447 = arith.addf %445, %446 : vector<2x32xf32>
    %448 = math.tanh %447 : vector<2x32xf32>
    %449 = arith.mulf %444, %448 : vector<2x32xf32>
    %c12 = arith.constant 12 : index
    %c0_83 = arith.constant 0 : index
    %450 = vector.load %arg10[%c12, %c0_83] : memref<16x32xf32, #tpu.memory_space<vmem>>, vector<2x32xf32>
    tpu.vector_store %arg10[%c12, %c0_83], %449 {strides = array<i32>} : memref<16x32xf32, #tpu.memory_space<vmem>>, vector<2x32xf32>,
    %451 = vector.extract_strided_slice %10 {offsets = [14, 128], sizes = [2, 128], strides = [1, 1]} : vector<16x256xf32> to vector<2x128xf32>
    %cst_84 = arith.constant dense<0.000000e+00> : vector<2x128xf32>
    %452 = tpu.matmul %449, %12, %cst_84 {dimension_numbers = #tpu.dot_dimension_numbers<[1], [0], [0], [1], [0, 0, 1, 1], [], []>} : vector<2x32xf32>, vector<32x128xf32>, vector<2x128xf32> -> vector<2x128xf32>
    %453 = arith.addf %451, %452 : vector<2x128xf32>
    %454 = vector.extract_strided_slice %453 {offsets = [0, 0], sizes = [2, 32], strides = [1, 1]} : vector<2x128xf32> to vector<2x32xf32>
    %455 = arith.negf %454 : vector<2x32xf32>
    %456 = math.exp %455 : vector<2x32xf32>
    %cst_85 = arith.constant 1.000000e+00 : f32
    %457 = vector.broadcast %cst_85 : f32 to vector<2x32xf32>
    %458 = arith.addf %457, %456 : vector<2x32xf32>
    %459 = arith.divf %457, %458 : vector<2x32xf32>
    %460 = vector.extract_strided_slice %453 {offsets = [0, 32], sizes = [2, 32], strides = [1, 1]} : vector<2x128xf32> to vector<2x32xf32>
    %461 = arith.negf %460 : vector<2x32xf32>
    %462 = math.exp %461 : vector<2x32xf32>
    %cst_86 = arith.constant 1.000000e+00 : f32
    %463 = vector.broadcast %cst_86 : f32 to vector<2x32xf32>
    %464 = arith.addf %463, %462 : vector<2x32xf32>
    %465 = arith.divf %463, %464 : vector<2x32xf32>
    %466 = vector.extract_strided_slice %453 {offsets = [0, 64], sizes = [2, 32], strides = [1, 1]} : vector<2x128xf32> to vector<2x32xf32>
    %467 = math.tanh %466 : vector<2x32xf32>
    %468 = vector.extract_strided_slice %453 {offsets = [0, 96], sizes = [2, 32], strides = [1, 1]} : vector<2x128xf32> to vector<2x32xf32>
    %469 = arith.negf %468 : vector<2x32xf32>
    %470 = math.exp %469 : vector<2x32xf32>
    %cst_87 = arith.constant 1.000000e+00 : f32
    %471 = vector.broadcast %cst_87 : f32 to vector<2x32xf32>
    %472 = arith.addf %471, %470 : vector<2x32xf32>
    %473 = arith.divf %471, %472 : vector<2x32xf32>
    %474 = arith.mulf %465, %447 : vector<2x32xf32>
    %475 = arith.mulf %459, %467 : vector<2x32xf32>
    %476 = arith.addf %474, %475 : vector<2x32xf32>
    %477 = math.tanh %476 : vector<2x32xf32>
    %478 = arith.mulf %473, %477 : vector<2x32xf32>
    %c14 = arith.constant 14 : index
    %c0_88 = arith.constant 0 : index
    %479 = vector.load %arg10[%c14, %c0_88] : memref<16x32xf32, #tpu.memory_space<vmem>>, vector<2x32xf32>
    tpu.vector_store %arg10[%c14, %c0_88], %478 {strides = array<i32>} : memref<16x32xf32, #tpu.memory_space<vmem>>, vector<2x32xf32>,
    %c0_89 = arith.constant 0 : index
    %c0_90 = arith.constant 0 : index
    %480 = vector.load %arg10[%c0_89, %c0_90] : memref<16x32xf32, #tpu.memory_space<vmem>>, vector<16x32xf32>
    %c0_91 = arith.constant 0 : index
    %c0_92 = arith.constant 0 : index
    %481 = vector.load %arg7[%c0_91, %c0_92] : memref<32x16xf32, #tpu.memory_space<vmem>>, vector<32x16xf32>
    %cst_93 = arith.constant dense<0.000000e+00> : vector<16x16xf32>
    %482 = tpu.matmul %480, %481, %cst_93 {dimension_numbers = #tpu.dot_dimension_numbers<[1], [0], [0], [1], [0, 0, 1, 1], [], []>} : vector<16x32xf32>, vector<32x16xf32>, vector<16x16xf32> -> vector<16x16xf32>
    %c0_94 = arith.constant 0 : index
    %c0_95 = arith.constant 0 : index
    %483 = vector.load %arg8[%c0_94, %c0_95] : memref<1x16xf32, #tpu.memory_space<vmem>>, vector<1x16xf32>
    %484 = vector.broadcast %483 : vector<1x16xf32> to vector<16x16xf32>
    %485 = arith.addf %482, %484 : vector<16x16xf32>
    %c0_96 = arith.constant 0 : index
    %c0_97 = arith.constant 0 : index
    %486 = vector.load %arg9[%c0_96, %c0_97] : memref<16x16xf32, #tpu.memory_space<vmem>>, vector<16x16xf32>
    tpu.vector_store %arg9[%c0_96, %c0_97], %485 {strides = array<i32>} : memref<16x16xf32, #tpu.memory_space<vmem>>, vector<16x16xf32>,
    return
  }
}

</mosaic_0001>

<bundles_post_ra>
// kernel: seq2seq_forward.1
= control target key start
LH: loop header
LB: loop body
LE: loop exit
PB: predicated region body
PF: predicated region fallthrough
CT: control target
= control target key end

     0   :  { %v2655_v0 = vmov 0   ;;  %v2656_v2 = vmov 0.0|0.0   ;;  %v2657_v9 = vmov 0.0   ;;  %vm2658_vm0 = vmmov 0   ;;  %s2659_s27 = smov 64   ;;  %s3071_s0 = inlined_call_operand.vmem [shape: s32[16,1], index: 0, kind: input, shape index: {}]   ;;  %s3072_s3 = inlined_call_operand.vmem [shape: f32[32,128], index: 3, kind: input, shape index: {}]   ;;  %s3073_s1 = inlined_call_operand.vmem [shape: f32[16,256], index: 1, kind: input, shape index: {}]   ;;  %s3074_s2 = inlined_call_operand.vmem [shape: f32[1,256], index: 2, kind: input, shape index: {}]   ;;  %s3075_s4 = inlined_call_operand.vmem [shape: f32[32,32], index: 4, kind: input, shape index: {}]   ;;  %s3076_s6 = inlined_call_operand.vmem [shape: f32[32,128], index: 6, kind: input, shape index: {}]   ;;  %s3077_s5 = inlined_call_operand.vmem [shape: f32[1,32], index: 5, kind: input, shape index: {}]   ;;  %s3078_s7 = inlined_call_operand.vmem [shape: f32[32,16], index: 7, kind: input, shape index: {}]   ;;  %s3079_s8 = inlined_call_operand.vmem [shape: f32[1,16], index: 8, kind: input, shape index: {}]   ;;  %s3080_s9 = inlined_call_operand.vmem [shape: f32[16,16], index: 9, kind: output, shape index: {}]  }
   0x1   :  { %2524 = vset.pattern.permute.xlu0 %v2655_v0  ;;  %v32_v1 = vld [vmem:[%s3071_s0] sm:$0xff]  ;;  %2408 = vmatprep.subr.bf16.mxu1 %v2656_v2  ;;  %v149_v4 = vld [vmem:[%s3072_s3 + $0x8] sm:$0xff]  ;;  %v51_v7 = vld [vmem:[%s3073_s1 + $0x18] sm:$0xff]  ;;  %v34_v16 = vlaneseq  ;;  %vm64_vm1 = vcmask 130048   ;;  %vm156_vm4 = vcmask 261120   ;;  %vm1007_vm5 = vcmask 1041408  }
   0x2   :  { %v148_v3 = vld [vmem:[%s3072_s3] sm:$0xff]  ;;  %37 = vperm.xlu0 %2524, %v32_v1   ;;  %v49_v6 = vld [vmem:[%s3073_s1 + $0x8] sm:$0xff]  ;;  %135 = vmatprep.mubr.f32.mxu0 %v2657_v9  ;;  %v50_v11 = vld [vmem:[%s3073_s1 + $0x10] sm:$0xff]  ;;  %vm1202_vm6 = vcmask 254976   ;;  %vm1311_vm7 = vcmask 257026   ;;  %vm1535_vm8 = vcmask 261126  }
   0x3   :  { %v2721_v5 = vpack.c.bf16 %v149_v4, %v148_v3  ;;  %v48_v8 = vld [vmem:[%s3073_s1] sm:$0xff]  ;;  %v2404_v10 = vpack.c.bf16 %v51_v7, %v49_v6  ;;  %v150_v12 = vld [vmem:[%s3072_s3 + $0x10] sm:$0xff]  ;;  %v151_v13 = vld [vmem:[%s3072_s3 + $0x18] sm:$0xff]  ;;  %2214 = vmatprep.mubr.msk.f32.mxu1 %vm2658_vm0, %v2657_v9  ;;  %v35_v17 = vand.u32 127, %v34_v16  ;;  %v2765_v22 = vshrl.u32 %v34_v16, 7 }
   0x4   :  { %v2406_v14 = vpack.c.bf16 %v50_v11, %v48_v8  ;;  %v2743_v15 = vpack.c.bf16 %v151_v13, %v150_v12  ;;  %v2771_v24 = vld [vmem:[%s3074_s2] sm:$0x3]  ;;  %v33_v31 = vld [vmem:[%s3071_s0 + $0x8] sm:$0xff]  ;;  %s2660_s2 = smov 32   ;;  %vm1423_vm9 = vcmask 259076  }
   0x5   :  { %2410 = vmatpush3.bf16.msra.mxu1 %v2721_v5  ;;  %2405 = vmatprep.subr.bf16.mxu0 %v2404_v10  ;;  %v56_v23 = vsub.s32 0, %v2765_v22 }
   0x6   :  { %2411 = vmatprep.subr.bf16.mxu1 %v2656_v2  ;;  %2407 = vmatpush1.bf16.msra.mxu0 %v2406_v14 }
   0x7   :  { %2414 = vmatprep.subr.bf16.mxu0 %v2656_v2  ;;  %v2774_v25 = vrot.slane %v2771_v24, %v56_v23 }
   0x9   :  { %2413 = vmatpush3.bf16.msra.mxu1 %v2743_v15 }
   0xa   :  { %2420 = vmatprep.subr.bf16.mxu1 %v2656_v2 }
   0xc   :  { %2215 = vmatmul.mubr.f32.vlgmr.msra.gmra.mrb[0].mxu1 %v2657_v9 }
   0xd   :  { %2422 = vmatpush3.bf16.msra.mxu1 %v2721_v5  ;;  %2236 = vmatprep.mubr.msk.f32.mxu1 %vm2658_vm0, %v2657_v9 }
   0xe   :  { %2423 = vmatprep.subr.bf16.mxu1 %v2656_v2 }
  0x11   :  { %2425 = vmatpush3.bf16.msra.mxu1 %v2743_v15 }
  0x12   :  { %2432 = vmatprep.subr.bf16.mxu1 %v2656_v2 }
  0x81   :  { %v38_v18 = vpop.permute.xlu0 %37 }
  0x82   :  { %vm42_vm2 = vcmp.eq.s32.totalorder %v35_v17, %v38_v18 }
  0x83   :  { %v2075_v19 = vsel %vm42_vm2, 1.0, %v2657_v9 }
  0x84   :  { %2077 = vmatmul.mubr.msk.f32.vlgmr.msra.gmra.mrb[0].mxu0 %vm64_vm1, %v2075_v19 }
  0x85   :  { %141 = vmatprep.mubr.f32.mxu0 %v2657_v9  ;;  %2416 = vmatpush3.bf16.msra.mxu0 %v2721_v5 }
  0x86   :  { %2417 = vmatprep.subr.bf16.mxu0 %v2656_v2 }
  0x89   :  { %2419 = vmatpush3.bf16.msra.mxu0 %v2743_v15 }
  0x8a   :  { %2426 = vmatprep.subr.bf16.mxu0 %v2656_v2 }
  0xdf   :  { %v226_v20 = vpop.f32.mrb[0].mxu1 }
  0xe0   :  { %v2216_v21 = vpop.f32.mrb[1].mxu1 }
 0x157   :  { %v137_v26 = vpop.f32.mrb[0].mxu0 }
 0x158   :  { %v2777_v27 = vadd.f32 %v137_v26, %v2774_v25  ;;  %v2779_v28 = vpop.f32.mrb[1].mxu0 }
 0x15a   :  { %v230_v29 = vadd.f32 %v226_v20, %v2777_v27 }
 0x15c   :  { %2525 = vtanh.f32 %v230_v29  ;;  %v2079_v32 = vmul.f32 -1.442695, %v230_v29 }
 0x15e   :  { %2527 = vpow2.f32 %v2079_v32 }
 0x166   :  { %v2526_v30 = vpop.eup %2525 }
 0x167   :  { %240 = vrot.lane.b32.xlu0 %v2526_v30, %s2659_s27 }
 0x168   :  { %v2528_v33 = vpop.eup %2527 }
 0x169   :  { %v234_v34 = vadd.f32 1.0, %v2528_v33 }
 0x16b   :  { %40 = vperm.xlu0 %2524, %v33_v31   ;;  %2529 = vrcp.f32 %v234_v34 }
 0x175   :  { %v2530_v35 = vpop.eup %2529 }
 0x176   :  { %v238_v40 = vmul.f32 0.0, %v2530_v35 }
 0x1d9   :  { %v241_v36 = vpop.permute.xlu0 %240 }
 0x1da   :  { %v243_v37 = vmul.f32 %v2530_v35, %v241_v36 }
 0x1dc   :  { %245 = vrot.lane.b32.xlu1 %v243_v37, %s2660_s2 }
 0x1ea   :  { %v41_v38 = vpop.permute.xlu0 %40 }
 0x1eb   :  { %vm43_vm3 = vcmp.eq.s32.totalorder %v35_v17, %v41_v38 }
 0x1ec   :  { %v2076_v39 = vsel %vm43_vm3, 1.0, %v2657_v9 }
 0x1ed   :  { %2078 = vmatmul.mubr.msk.f32.gmra.mrb[2].mxu0 %vm64_vm1, %v2076_v39 }
 0x1ee   :  { %2225 = vmatprep.mubr.msk.f32.mxu0 %vm2658_vm0, %v2657_v9 }
 0x24e   :  { %v246_v41 = vpop.permute.xlu1 %245 }
 0x24f   :  { %v248_v42 = vadd.f32 %v246_v41, %v238_v40 }
 0x251   :  { %2531 = vtanh.f32 %v248_v42  ;;  %v342_v60 = vrot.slane %v248_v42, 6 }
 0x25b   :  { %v2532_v43 = vpop.eup %2531 }
 0x25c   :  { %251 = vrot.lane.b32.xlu1 %v2532_v43, %s2659_s27 }
 0x2c0   :  { %v2792_v44 = vpop.f32.mrb[2].mxu0 }
 0x2c1   :  { %v2794_v45 = vpop.f32.mrb[3].mxu0 }
 0x2ce   :  { %v252_v46 = vpop.permute.xlu1 %251 }
 0x2cf   :  { %v254_v47 = vmul.f32 %v2530_v35, %v252_v46 }
 0x2d1   :  { %256 = vrot.lane.b32.xlu1 %v254_v47, %s2660_s2 }
 0x343   :  { %v257_v48 = vpop.permute.xlu1 %256 }
 0x344   :  { %2226 = vmatmul.mubr.msk.f32.vlgmr.msra.gmra.mrb[4].mxu0 %vm156_vm4, %v257_v48 }
 0x345   :  { %2428 = vmatpush3.bf16.msra.mxu0 %v2721_v5  ;;  %2247 = vmatprep.mubr.msk.f32.mxu0 %vm2658_vm0, %v2657_v9 }
 0x346   :  { %2429 = vmatprep.subr.bf16.mxu0 %v2656_v2 }
 0x349   :  { %2431 = vmatpush3.bf16.msra.mxu0 %v2743_v15 }
 0x34a   :  { %2438 = vmatprep.subr.bf16.mxu0 %v2656_v2 }
 0x417   :  { %v326_v49 = vpop.f32.mrb[4].mxu0 }
 0x418   :  { %v331_v50 = vrot.slane %v326_v49, 6  ;;  %v2227_v51 = vpop.f32.mrb[5].mxu0 }
 0x41a   :  { %v333_v52 = vadd.f32 %v331_v50, %v2777_v27 }
 0x41c   :  { %2533 = vtanh.f32 %v333_v52  ;;  %v2081_v54 = vmul.f32 -1.442695, %v333_v52 }
 0x41e   :  { %2535 = vpow2.f32 %v2081_v54 }
 0x426   :  { %v2534_v53 = vpop.eup %2533 }
 0x427   :  { %346 = vrot.lane.b32.xlu0 %v2534_v53, %s2659_s27 }
 0x428   :  { %v2536_v55 = vpop.eup %2535 }
 0x429   :  { %v337_v56 = vadd.f32 1.0, %v2536_v55  ;;  %v2842_v55 = vadd.f32 %v2792_v44, %v2774_v25 }
 0x42b   :  { %2537 = vrcp.f32 %v337_v56 }
 0x435   :  { %v2538_v57 = vpop.eup %2537 }
 0x436   :  { %v344_v61 = vmul.f32 %v2538_v57, %v342_v60 }
 0x499   :  { %v347_v58 = vpop.permute.xlu0 %346 }
 0x49a   :  { %v349_v59 = vmul.f32 %v2538_v57, %v347_v58 }
 0x49c   :  { %351 = vrot.lane.b32.xlu1 %v349_v59, %s2660_s2 }
 0x50e   :  { %v352_v62 = vpop.permute.xlu1 %351 }
 0x50f   :  { %v354_v63 = vadd.f32 %v352_v62, %v344_v61 }
 0x511   :  { %2539 = vtanh.f32 %v354_v63  ;;  %v449_v20 = vrot.slane %v354_v63, 6 }
 0x51b   :  { %v2540_v0 = vpop.eup %2539 }
 0x51c   :  { %357 = vrot.lane.b32.xlu0 %v2540_v0, %s2659_s27 }
 0x58e   :  { %v358_v1 = vpop.permute.xlu0 %357 }
 0x58f   :  { %v360_v3 = vmul.f32 %v2538_v57, %v358_v1 }
 0x591   :  { %v362_v4 = vrot.slane %v360_v3, 2 }
 0x593   :  { %363 = vrot.lane.b32.xlu1 %v362_v4, %s2660_s2 }
 0x605   :  { %v364_v6 = vpop.permute.xlu1 %363 }
 0x606   :  { %2237 = vmatmul.mubr.msk.f32.vlgmr.msra.gmra.mrb[2].mxu1 %vm156_vm4, %v364_v6 }
 0x607   :  { %2434 = vmatpush3.bf16.msra.mxu1 %v2721_v5  ;;  %2258 = vmatprep.mubr.msk.f32.mxu1 %vm2658_vm0, %v2657_v9 }
 0x608   :  { %2435 = vmatprep.subr.bf16.mxu1 %v2656_v2 }
 0x60b   :  { %2437 = vmatpush3.bf16.msra.mxu1 %v2743_v15 }
 0x60c   :  { %2444 = vmatprep.subr.bf16.mxu1 %v2656_v2 }
 0x6d9   :  { %v433_v7 = vpop.f32.mrb[2].mxu1 }
 0x6da   :  { %v438_v8 = vrot.slane %v433_v7, 4  ;;  %v2238_v10 = vpop.f32.mrb[3].mxu1 }
 0x6dc   :  { %v440_v11 = vadd.f32 %v438_v8, %v2777_v27 }
 0x6de   :  { %2541 = vtanh.f32 %v440_v11  ;;  %v2083_v13 = vmul.f32 -1.442695, %v440_v11 }
 0x6e0   :  { %2543 = vpow2.f32 %v2083_v13 }
 0x6e8   :  { %v2542_v12 = vpop.eup %2541 }
 0x6e9   :  { %453 = vrot.lane.b32.xlu0 %v2542_v12, %s2659_s27 }
 0x6ea   :  { %v2544_v14 = vpop.eup %2543 }
 0x6eb   :  { %v444_v16 = vadd.f32 1.0, %v2544_v14 }
 0x6ed   :  { %2545 = vrcp.f32 %v444_v16 }
 0x6f7   :  { %v2546_v17 = vpop.eup %2545 }
 0x6f8   :  { %v451_v21 = vmul.f32 %v2546_v17, %v449_v20 }
 0x75b   :  { %v454_v18 = vpop.permute.xlu0 %453 }
 0x75c   :  { %v456_v19 = vmul.f32 %v2546_v17, %v454_v18 }
 0x75e   :  { %458 = vrot.lane.b32.xlu1 %v456_v19, %s2660_s2 }
 0x7d0   :  { %v459_v23 = vpop.permute.xlu1 %458 }
 0x7d1   :  { %v461_v26 = vadd.f32 %v459_v23, %v451_v21 }
 0x7d3   :  { %2547 = vtanh.f32 %v461_v26  ;;  %v556_v47 = vrot.slane %v461_v26, 6 }
 0x7dd   :  { %v2548_v29 = vpop.eup %2547 }
 0x7de   :  { %464 = vrot.lane.b32.xlu0 %v2548_v29, %s2659_s27 }
 0x850   :  { %v465_v30 = vpop.permute.xlu0 %464 }
 0x851   :  { %v467_v31 = vmul.f32 %v2546_v17, %v465_v30 }
 0x853   :  { %v469_v32 = vrot.slane %v467_v31, 4 }
 0x855   :  { %470 = vrot.lane.b32.xlu1 %v469_v32, %s2660_s2 }
 0x8c7   :  { %v471_v33 = vpop.permute.xlu1 %470 }
 0x8c8   :  { %2248 = vmatmul.mubr.msk.f32.vlgmr.msra.gmra.mrb[6].mxu0 %vm156_vm4, %v471_v33 }
 0x8c9   :  { %2440 = vmatpush3.bf16.msra.mxu0 %v2721_v5  ;;  %2269 = vmatprep.mubr.msk.f32.mxu0 %vm2658_vm0, %v2657_v9 }
 0x8ca   :  { %2441 = vmatprep.subr.bf16.mxu0 %v2656_v2 }
 0x8cd   :  { %2443 = vmatpush3.bf16.msra.mxu0 %v2743_v15 }
 0x8ce   :  { %2450 = vmatprep.subr.bf16.mxu0 %v2656_v2 }
 0x99b   :  { %v540_v34 = vpop.f32.mrb[6].mxu0 }
 0x99c   :  { %v545_v35 = vrot.slane %v540_v34, 2  ;;  %v2249_v36 = vpop.f32.mrb[7].mxu0 }
 0x99e   :  { %v547_v37 = vadd.f32 %v545_v35, %v2777_v27 }
 0x9a0   :  { %2549 = vtanh.f32 %v547_v37  ;;  %v2085_v39 = vmul.f32 -1.442695, %v547_v37 }
 0x9a2   :  { %2551 = vpow2.f32 %v2085_v39 }
 0x9aa   :  { %v2550_v38 = vpop.eup %2549 }
 0x9ab   :  { %560 = vrot.lane.b32.xlu0 %v2550_v38, %s2659_s27 }
 0x9ac   :  { %v2552_v40 = vpop.eup %2551 }
 0x9ad   :  { %v551_v41 = vadd.f32 1.0, %v2552_v40 }
 0x9af   :  { %2553 = vrcp.f32 %v551_v41 }
 0x9b9   :  { %v2554_v42 = vpop.eup %2553 }
 0x9ba   :  { %v558_v48 = vmul.f32 %v2554_v42, %v556_v47 }
 0xa1d   :  { %v561_v43 = vpop.permute.xlu0 %560 }
 0xa1e   :  { %v563_v46 = vmul.f32 %v2554_v42, %v561_v43 }
 0xa20   :  { %565 = vrot.lane.b32.xlu1 %v563_v46, %s2660_s2 }
 0xa92   :  { %v566_v49 = vpop.permute.xlu1 %565 }
 0xa93   :  { %v568_v50 = vadd.f32 %v566_v49, %v558_v48 }
 0xa95   :  { %2555 = vtanh.f32 %v568_v50  ;;  %v660_v25 = vrot.slane %v568_v50, 6 }
 0xa9f   :  { %v2556_v27 = vpop.eup %2555 }
 0xaa0   :  { %571 = vrot.lane.b32.xlu0 %v2556_v27, %s2659_s27 }
 0xb12   :  { %v572_v51 = vpop.permute.xlu0 %571 }
 0xb13   :  { %v574_v52 = vmul.f32 %v2554_v42, %v572_v51 }
 0xb15   :  { %v576_v53 = vrot.slane %v574_v52, 6 }
 0xb17   :  { %577 = vrot.lane.b32.xlu1 %v576_v53, %s2660_s2 }
 0xb89   :  { %v578_v54 = vpop.permute.xlu1 %577 }
 0xb8a   :  { %2259 = vmatmul.mubr.msk.f32.vlgmr.msra.gmra.mrb[4].mxu1 %vm156_vm4, %v578_v54 }
 0xb8b   :  { %2446 = vmatpush3.bf16.msra.mxu1 %v2721_v5  ;;  %2280 = vmatprep.mubr.msk.f32.mxu1 %vm2658_vm0, %v2657_v9 }
 0xb8c   :  { %2447 = vmatprep.subr.bf16.mxu1 %v2656_v2 }
 0xb8f   :  { %2449 = vmatpush3.bf16.msra.mxu1 %v2743_v15 }
 0xb90   :  { %2456 = vmatprep.subr.bf16.mxu1 %v2656_v2 }
 0xc5d   :  { %v647_v56 = vpop.f32.mrb[4].mxu1 }
 0xc5e   :  { %v651_v57 = vadd.f32 %v647_v56, %v2842_v55  ;;  %v2260_v58 = vpop.f32.mrb[5].mxu1 }
 0xc60   :  { %2557 = vtanh.f32 %v651_v57  ;;  %v2087_v60 = vmul.f32 -1.442695, %v651_v57 }
 0xc62   :  { %2559 = vpow2.f32 %v2087_v60 }
 0xc6a   :  { %v2558_v59 = vpop.eup %2557 }
 0xc6b   :  { %664 = vrot.lane.b32.xlu0 %v2558_v59, %s2659_s27 }
 0xc6c   :  { %v2560_v61 = vpop.eup %2559 }
 0xc6d   :  { %v655_v62 = vadd.f32 1.0, %v2560_v61 }
 0xc6f   :  { %2561 = vrcp.f32 %v655_v62 }
 0xc79   :  { %v2562_v63 = vpop.eup %2561 }
 0xc7a   :  { %v662_v44 = vmul.f32 %v2562_v63, %v660_v25 }
 0xcdd   :  { %v665_v0 = vpop.permute.xlu0 %664 }
 0xcde   :  { %v667_v1 = vmul.f32 %v2562_v63, %v665_v0 }
 0xce0   :  { %669 = vrot.lane.b32.xlu1 %v667_v1, %s2660_s2 }
 0xd52   :  { %v670_v3 = vpop.permute.xlu1 %669 }
 0xd53   :  { %v672_v4 = vadd.f32 %v670_v3, %v662_v44 }
 0xd55   :  { %2563 = vtanh.f32 %v672_v4 }
 0xd5f   :  { %v2564_v6 = vpop.eup %2563 }
 0xd60   :  { %675 = vrot.lane.b32.xlu0 %v2564_v6, %s2659_s27 }
 0xdd2   :  { %v676_v7 = vpop.permute.xlu0 %675 }
 0xdd3   :  { %v678_v8 = vmul.f32 %v2562_v63, %v676_v7 }
 0xdd5   :  { %680 = vrot.lane.b32.xlu1 %v678_v8, %s2660_s2  ;;  %v1009_v8 = vld [vmem:[%s3075_s4] sm:$0xff] }
 0xe47   :  { %v681_v10 = vpop.permute.xlu1 %680 }
 0xe48   :  { %2270 = vmatmul.mubr.msk.f32.vlgmr.msra.gmra.mrb[8].mxu0 %vm156_vm4, %v681_v10  ;;  %v1010_v10 = vld [vmem:[%s3075_s4 + $0x8] sm:$0xff] }
 0xe49   :  { %2452 = vmatpush3.bf16.msra.mxu0 %v2721_v5  ;;  %2291 = vmatprep.mubr.msk.f32.mxu0 %vm2658_vm0, %v2657_v9 }
 0xe4a   :  { %2453 = vmatprep.subr.bf16.mxu0 %v2656_v2 }
 0xe4d   :  { %2455 = vmatpush3.bf16.msra.mxu0 %v2743_v15  ;;  %v766_v15 = vrot.slane %v672_v4, 6 }
 0xe4e   :  { %2462 = vmatprep.subr.bf16.mxu0 %v2656_v2 }
 0xf1b   :  { %v750_v11 = vpop.f32.mrb[8].mxu0 }
 0xf1c   :  { %v755_v12 = vrot.slane %v750_v11, 6  ;;  %v2271_v13 = vpop.f32.mrb[9].mxu0  ;;  %v1011_v11 = vld [vmem:[%s3075_s4 + $0x10] sm:$0xff] }
 0xf1d   :  { %v1012_v13 = vld [vmem:[%s3075_s4 + $0x18] sm:$0xff] }
 0xf1e   :  { %v757_v14 = vadd.f32 %v755_v12, %v2842_v55  ;;  %v2457_v12 = vpack.c.bf16 %v1010_v10, %v1009_v8 }
 0xf20   :  { %2565 = vtanh.f32 %v757_v14  ;;  %v2089_v17 = vmul.f32 -1.442695, %v757_v14  ;;  %v2460_v14 = vpack.c.bf16 %v1012_v13, %v1011_v11 }
 0xf22   :  { %2567 = vpow2.f32 %v2089_v17 }
 0xf2a   :  { %v2566_v16 = vpop.eup %2565 }
 0xf2b   :  { %770 = vrot.lane.b32.xlu0 %v2566_v16, %s2659_s27 }
 0xf2c   :  { %v2568_v5 = vpop.eup %2567 }
 0xf2d   :  { %v761_v18 = vadd.f32 1.0, %v2568_v5 }
 0xf2f   :  { %2569 = vrcp.f32 %v761_v18 }
 0xf39   :  { %v2570_v19 = vpop.eup %2569 }
 0xf3a   :  { %v768_v23 = vmul.f32 %v2570_v19, %v766_v15  ;;  %v152_v15 = vld [vmem:[%s3076_s6] sm:$0xff] }
 0xf9d   :  { %v771_v20 = vpop.permute.xlu0 %770 }
 0xf9e   :  { %v773_v21 = vmul.f32 %v2570_v19, %v771_v20 }
 0xfa0   :  { %775 = vrot.lane.b32.xlu1 %v773_v21, %s2660_s2 }
0x1012   :  { %v776_v26 = vpop.permute.xlu1 %775 }
0x1013   :  { %v778_v29 = vadd.f32 %v776_v26, %v768_v23  ;;  %v153_v23 = vld [vmem:[%s3076_s6 + $0x8] sm:$0xff]  ;;  %v154_v26 = vld [vmem:[%s3076_s6 + $0x10] sm:$0xff] }
0x1015   :  { %2571 = vtanh.f32 %v778_v29  ;;  %v873_v48 = vrot.slane %v778_v29, 6  ;;  %v2904_v29 = vpack.c.bf16 %v153_v23, %v152_v15 }
0x101f   :  { %v2572_v30 = vpop.eup %2571 }
0x1020   :  { %781 = vrot.lane.b32.xlu0 %v2572_v30, %s2659_s27  ;;  %v155_v30 = vld [vmem:[%s3076_s6 + $0x18] sm:$0xff] }
0x1092   :  { %v782_v31 = vpop.permute.xlu0 %781 }
0x1093   :  { %v784_v32 = vmul.f32 %v2570_v19, %v782_v31  ;;  %v2910_v31 = vpack.c.bf16 %v155_v30, %v154_v26 }
0x1095   :  { %v786_v33 = vrot.slane %v784_v32, 2  ;;  %v2094_v32 = vld [vmem:[%s3077_s5] ss:$0 sm:$0xff] }
0x1097   :  { %787 = vrot.lane.b32.xlu1 %v786_v33, %s2660_s2 }
0x1109   :  { %v788_v34 = vpop.permute.xlu1 %787 }
0x110a   :  { %2281 = vmatmul.mubr.msk.f32.vlgmr.msra.gmra.mrb[6].mxu1 %vm156_vm4, %v788_v34 }
0x110b   :  { %2302 = vmatprep.mubr.msk.f32.mxu1 %vm2658_vm0, %v2657_v9  ;;  %2458 = vmatpush3.bf16.msra.mxu1 %v2457_v12 }
0x110c   :  { %2459 = vmatprep.subr.bf16.mxu1 %v2656_v2 }
0x110f   :  { %2461 = vmatpush3.bf16.msra.mxu1 %v2460_v14 }
0x1110   :  { %2468 = vmatprep.subr.bf16.mxu1 %v2656_v2 }
0x11dd   :  { %v857_v35 = vpop.f32.mrb[6].mxu1 }
0x11de   :  { %v862_v36 = vrot.slane %v857_v35, 4  ;;  %v2282_v37 = vpop.f32.mrb[7].mxu1 }
0x11e0   :  { %v864_v38 = vadd.f32 %v862_v36, %v2842_v55 }
0x11e2   :  { %2573 = vtanh.f32 %v864_v38  ;;  %v2091_v40 = vmul.f32 -1.442695, %v864_v38  ;;  %v60_v38 = vsub.s32 1, %v2765_v22 }
0x11e4   :  { %2575 = vpow2.f32 %v2091_v40 }
0x11ec   :  { %v2574_v39 = vpop.eup %2573 }
0x11ed   :  { %877 = vrot.lane.b32.xlu0 %v2574_v39, %s2659_s27  ;;  %v2932_v39 = vrot.slane %v2771_v24, %v60_v38 }
0x11ee   :  { %v2576_v41 = vpop.eup %2575 }
0x11ef   :  { %v868_v42 = vadd.f32 1.0, %v2576_v41  ;;  %v2936_v40 = vadd.f32 %v2779_v28, %v2932_v39 }
0x11f1   :  { %2577 = vrcp.f32 %v868_v42 }
0x11fb   :  { %v2578_v43 = vpop.eup %2577 }
0x11fc   :  { %v875_v49 = vmul.f32 %v2578_v43, %v873_v48 }
0x125f   :  { %v878_v46 = vpop.permute.xlu0 %877 }
0x1260   :  { %v880_v47 = vmul.f32 %v2578_v43, %v878_v46 }
0x1262   :  { %882 = vrot.lane.b32.xlu1 %v880_v47, %s2660_s2 }
0x12d4   :  { %v883_v50 = vpop.permute.xlu1 %882 }
0x12d5   :  { %v885_v27 = vadd.f32 %v883_v50, %v875_v49 }
0x12d7   :  { %2579 = vtanh.f32 %v885_v27  ;;  %v980_v3 = vrot.slane %v885_v27, 6 }
0x12e1   :  { %v2580_v51 = vpop.eup %2579 }
0x12e2   :  { %888 = vrot.lane.b32.xlu0 %v2580_v51, %s2659_s27 }
0x1354   :  { %v889_v52 = vpop.permute.xlu0 %888 }
0x1355   :  { %v891_v53 = vmul.f32 %v2578_v43, %v889_v52 }
0x1357   :  { %v893_v54 = vrot.slane %v891_v53, 4 }
0x1359   :  { %894 = vrot.lane.b32.xlu1 %v893_v54, %s2660_s2 }
0x13cb   :  { %v895_v56 = vpop.permute.xlu1 %894 }
0x13cc   :  { %2292 = vmatmul.mubr.msk.f32.vlgmr.msra.gmra.mrb[10].mxu0 %vm156_vm4, %v895_v56 }
0x13cd   :  { %2313 = vmatprep.mubr.msk.f32.mxu0 %vm2658_vm0, %v2657_v9  ;;  %2464 = vmatpush3.bf16.msra.mxu0 %v2904_v29 }
0x13ce   :  { %2465 = vmatprep.subr.bf16.mxu0 %v2656_v2 }
0x13d1   :  { %2467 = vmatpush3.bf16.msra.mxu0 %v2910_v31 }
0x13d2   :  { %2474 = vmatprep.subr.bf16.mxu0 %v2656_v2 }
0x149f   :  { %v964_v57 = vpop.f32.mrb[10].mxu0 }
0x14a0   :  { %v969_v58 = vrot.slane %v964_v57, 2  ;;  %v2293_v59 = vpop.f32.mrb[11].mxu0 }
0x14a2   :  { %v971_v60 = vadd.f32 %v969_v58, %v2842_v55 }
0x14a4   :  { %2581 = vtanh.f32 %v971_v60  ;;  %v2093_v62 = vmul.f32 -1.442695, %v971_v60 }
0x14a6   :  { %2583 = vpow2.f32 %v2093_v62 }
0x14ae   :  { %v2582_v61 = vpop.eup %2581 }
0x14af   :  { %984 = vrot.lane.b32.xlu0 %v2582_v61, %s2659_s27 }
0x14b0   :  { %v2584_v63 = vpop.eup %2583 }
0x14b1   :  { %v975_v0 = vadd.f32 1.0, %v2584_v63 }
0x14b3   :  { %2585 = vrcp.f32 %v975_v0 }
0x14bd   :  { %v2586_v1 = vpop.eup %2585 }
0x14be   :  { %v982_v4 = vmul.f32 %v2586_v1, %v980_v3 }
0x1521   :  { %v985_v25 = vpop.permute.xlu0 %984 }
0x1522   :  { %v987_v44 = vmul.f32 %v2586_v1, %v985_v25 }
0x1524   :  { %989 = vrot.lane.b32.xlu1 %v987_v44, %s2660_s2 }
0x1596   :  { %v990_v6 = vpop.permute.xlu1 %989 }
0x1597   :  { %v992_v7 = vadd.f32 %v990_v6, %v982_v4 }
0x1599   :  { %2587 = vtanh.f32 %v992_v7  ;;  %v1003_v55 = vrot.slane %v992_v7, 4 }
0x159b   :  { %1004 = vrot.lane.b32.xlu1 %v1003_v55, %s2659_s27 }
0x15a3   :  { %v2588_v16 = vpop.eup %2587 }
0x15a4   :  { %995 = vrot.lane.b32.xlu0 %v2588_v16, %s2659_s27 }
0x160d   :  { %v1005_v19 = vpop.permute.xlu1 %1004 }
0x1616   :  { %v996_v17 = vpop.permute.xlu0 %995 }
0x1617   :  { %v998_v5 = vmul.f32 %v2586_v1, %v996_v17 }
0x1619   :  { %v1000_v18 = vrot.slane %v998_v5, 6 }
0x161b   :  { %v1008_v20 = vsel %vm1007_vm5, %v1000_v18, %v1005_v19 }
0x161c   :  { %1021 = vrot.lane.b32.xlu0 %v1008_v20, %s2660_s2 }
0x168e   :  { %v1022_v21 = vpop.permute.xlu0 %1021 }
0x168f   :  { %2303 = vmatmul.mubr.msk.f32.vlgmr.msra.gmra.mrb[8].mxu1 %vm156_vm4, %v1022_v21 }
0x1690   :  { %2324 = vmatprep.mubr.msk.f32.mxu1 %vm2658_vm0, %v2657_v9  ;;  %2470 = vmatpush3.bf16.msra.mxu1 %v2904_v29 }
0x1691   :  { %2471 = vmatprep.subr.bf16.mxu1 %v2656_v2 }
0x1694   :  { %2473 = vmatpush3.bf16.msra.mxu1 %v2910_v31 }
0x1695   :  { %2480 = vmatprep.subr.bf16.mxu1 %v2656_v2 }
0x1762   :  { %v1091_v33 = vpop.f32.mrb[8].mxu1 }
0x1763   :  { %v1092_v34 = vadd.f32 %v2094_v32, %v1091_v33  ;;  %v2304_v35 = vpop.f32.mrb[9].mxu1 }
0x1765   :  { %2589 = vtanh.f32 %v1092_v34 }
0x176f   :  { %v2590_v36 = vpop.eup %2589 }
0x1770   :  { %2314 = vmatmul.mubr.msk.f32.vlgmr.msra.gmra.mrb[12].mxu0 %vm156_vm4, %v2590_v36  ;;  %v1177_v37 = vrot.slane %v2590_v36, 2 }
0x1771   :  { %2476 = vmatpush3.bf16.msra.mxu0 %v2904_v29  ;;  %2335 = vmatprep.mubr.msk.f32.mxu0 %vm2658_vm0, %v2657_v9 }
0x1772   :  { %1178 = vrot.lane.b32.xlu0 %v1177_v37, %s2660_s2  ;;  %2477 = vmatprep.subr.bf16.mxu0 %v2656_v2 }
0x1775   :  { %2479 = vmatpush3.bf16.msra.mxu0 %v2910_v31 }
0x1776   :  { %2486 = vmatprep.subr.bf16.mxu0 %v2656_v2 }
0x17e4   :  { %v1179_v28 = vpop.permute.xlu0 %1178 }
0x1843   :  { %v1165_v41 = vpop.f32.mrb[12].mxu0 }
0x1844   :  { %v1169_v42 = vadd.f32 %v1165_v41, %v2936_v40  ;;  %v2315_v43 = vpop.f32.mrb[13].mxu0 }
0x1846   :  { %2591 = vtanh.f32 %v1169_v42  ;;  %v2097_v47 = vmul.f32 -1.442695, %v1169_v42 }
0x1848   :  { %2593 = vpow2.f32 %v2097_v47 }
0x1850   :  { %v2592_v46 = vpop.eup %2591 }
0x1851   :  { %1183 = vrot.lane.b32.xlu1 %v2592_v46, %s2659_s27 }
0x1852   :  { %v2594_v48 = vpop.eup %2593 }
0x1853   :  { %v1173_v49 = vadd.f32 1.0, %v2594_v48 }
0x1855   :  { %2595 = vrcp.f32 %v1173_v49 }
0x185f   :  { %v2596_v22 = vpop.eup %2595 }
0x1860   :  { %v1181_v27 = vmul.f32 %v2596_v22, %v1179_v28 }
0x18c3   :  { %v1184_v24 = vpop.permute.xlu1 %1183 }
0x18c4   :  { %v1186_v50 = vmul.f32 %v2596_v22, %v1184_v24 }
0x18c6   :  { %1188 = vrot.lane.b32.xlu1 %v1186_v50, %s2660_s2 }
0x1938   :  { %v1189_v51 = vpop.permute.xlu1 %1188 }
0x1939   :  { %v1191_v52 = vadd.f32 %v1189_v51, %v1181_v27 }
0x193b   :  { %2597 = vtanh.f32 %v1191_v52  ;;  %v1288_v4 = vrot.slane %v1191_v52, 6 }
0x1945   :  { %v2598_v53 = vpop.eup %2597 }
0x1946   :  { %1194 = vrot.lane.b32.xlu0 %v2598_v53, %s2659_s27 }
0x19b8   :  { %v1195_v54 = vpop.permute.xlu0 %1194 }
0x19b9   :  { %v1197_v56 = vmul.f32 %v2596_v22, %v1195_v54 }
0x19bb   :  { %1199 = vrot.lane.b32.xlu1 %v1197_v56, %s2660_s2 }
0x1a2d   :  { %v1200_v57 = vpop.permute.xlu1 %1199 }
0x1a2e   :  { %1203 = vst.msk [vmem:[#allocation2] sm:$0x3] %vm1202_vm6, %v1200_v57  ;;  %2325 = vmatmul.mubr.msk.f32.vlgmr.msra.gmra.mrb[10].mxu1 %vm156_vm4, %v1200_v57 }
0x1a2f   :  { %2482 = vmatpush3.bf16.msra.mxu1 %v2904_v29  ;;  %2346 = vmatprep.mubr.msk.f32.mxu1 %vm2658_vm0, %v2657_v9 }
0x1a30   :  { %2483 = vmatprep.subr.bf16.mxu1 %v2656_v2 }
0x1a33   :  { %2485 = vmatpush3.bf16.msra.mxu1 %v2910_v31 }
0x1a34   :  { %2492 = vmatprep.subr.bf16.mxu1 %v2656_v2 }
0x1b01   :  { %v1272_v58 = vpop.f32.mrb[10].mxu1 }
0x1b02   :  { %v1277_v59 = vrot.slane %v1272_v58, 6  ;;  %v2326_v60 = vpop.f32.mrb[11].mxu1 }
0x1b03   :  { %v2997_v60 = vadd.f32 %v2794_v45, %v2932_v39 }
0x1b04   :  { %v1279_v61 = vadd.f32 %v1277_v59, %v2936_v40 }
0x1b06   :  { %2599 = vtanh.f32 %v1279_v61  ;;  %v2099_v63 = vmul.f32 -1.442695, %v1279_v61 }
0x1b08   :  { %2601 = vpow2.f32 %v2099_v63 }
0x1b10   :  { %v2600_v62 = vpop.eup %2599 }
0x1b11   :  { %1292 = vrot.lane.b32.xlu0 %v2600_v62, %s2659_s27 }
0x1b12   :  { %v2602_v0 = vpop.eup %2601 }
0x1b13   :  { %v1283_v1 = vadd.f32 1.0, %v2602_v0 }
0x1b15   :  { %2603 = vrcp.f32 %v1283_v1 }
0x1b1f   :  { %v2604_v25 = vpop.eup %2603 }
0x1b20   :  { %v1290_v6 = vmul.f32 %v2604_v25, %v1288_v4 }
0x1b83   :  { %v1293_v44 = vpop.permute.xlu0 %1292 }
0x1b84   :  { %v1295_v3 = vmul.f32 %v2604_v25, %v1293_v44 }
0x1b86   :  { %1297 = vrot.lane.b32.xlu1 %v1295_v3, %s2660_s2 }
0x1bf8   :  { %v1298_v7 = vpop.permute.xlu1 %1297 }
0x1bf9   :  { %v1300_v55 = vadd.f32 %v1298_v7, %v1290_v6 }
0x1bfb   :  { %2605 = vtanh.f32 %v1300_v55  ;;  %v1400_v30 = vrot.slane %v1300_v55, 6 }
0x1c05   :  { %v2606_v8 = vpop.eup %2605 }
0x1c06   :  { %1303 = vrot.lane.b32.xlu0 %v2606_v8, %s2659_s27 }
0x1c78   :  { %v1304_v10 = vpop.permute.xlu0 %1303 }
0x1c79   :  { %v2955_v11 = vmul.f32 %v2604_v25, %v1304_v10 }
0x1c7b   :  { %v1313_v12 = vrot.slane %v2955_v11, 2 }
0x1c7d   :  { %1314 = vrot.lane.b32.xlu1 %v1313_v12, %s2660_s2 }
0x1cef   :  { %v1315_v13 = vpop.permute.xlu1 %1314 }
0x1cf0   :  { %2336 = vmatmul.mubr.msk.f32.vlgmr.msra.gmra.mrb[14].mxu0 %vm156_vm4, %v1315_v13 }
0x1cf1   :  { %2488 = vmatpush3.bf16.msra.mxu0 %v2904_v29  ;;  %2357 = vmatprep.mubr.msk.f32.mxu0 %vm2658_vm0, %v2657_v9 }
0x1cf2   :  { %2489 = vmatprep.subr.bf16.mxu0 %v2656_v2 }
0x1cf5   :  { %2491 = vmatpush3.bf16.msra.mxu0 %v2910_v31 }
0x1cf6   :  { %2498 = vmatprep.subr.bf16.mxu0 %v2656_v2 }
0x1dc3   :  { %v1384_v14 = vpop.f32.mrb[14].mxu0 }
0x1dc4   :  { %v1389_v16 = vrot.slane %v1384_v14, 4  ;;  %v2337_v17 = vpop.f32.mrb[15].mxu0 }
0x1dc6   :  { %v1391_v5 = vadd.f32 %v1389_v16, %v2936_v40 }
0x1dc8   :  { %2607 = vtanh.f32 %v1391_v5  ;;  %v2101_v19 = vmul.f32 -1.442695, %v1391_v5 }
0x1dca   :  { %2609 = vpow2.f32 %v2101_v19 }
0x1dd2   :  { %v2608_v18 = vpop.eup %2607 }
0x1dd3   :  { %1404 = vrot.lane.b32.xlu0 %v2608_v18, %s2659_s27 }
0x1dd4   :  { %v2610_v20 = vpop.eup %2609 }
0x1dd5   :  { %v1395_v21 = vadd.f32 1.0, %v2610_v20 }
0x1dd7   :  { %2611 = vrcp.f32 %v1395_v21 }
0x1de1   :  { %v2612_v15 = vpop.eup %2611 }
0x1de2   :  { %v1402_v32 = vmul.f32 %v2612_v15, %v1400_v30 }
0x1e45   :  { %v1405_v23 = vpop.permute.xlu0 %1404 }
0x1e46   :  { %v1407_v26 = vmul.f32 %v2612_v15, %v1405_v23 }
0x1e48   :  { %1409 = vrot.lane.b32.xlu1 %v1407_v26, %s2660_s2 }
0x1eba   :  { %v1410_v33 = vpop.permute.xlu1 %1409 }
0x1ebb   :  { %v1412_v34 = vadd.f32 %v1410_v33, %v1402_v32 }
0x1ebd   :  { %2613 = vtanh.f32 %v1412_v34  ;;  %v1512_v51 = vrot.slane %v1412_v34, 6 }
0x1ec7   :  { %v2614_v35 = vpop.eup %2613 }
0x1ec8   :  { %1415 = vrot.lane.b32.xlu0 %v2614_v35, %s2659_s27 }
0x1f3a   :  { %v1416_v36 = vpop.permute.xlu0 %1415 }
0x1f3b   :  { %v2970_v37 = vmul.f32 %v2612_v15, %v1416_v36 }
0x1f3d   :  { %v1425_v38 = vrot.slane %v2970_v37, 4 }
0x1f3f   :  { %1426 = vrot.lane.b32.xlu1 %v1425_v38, %s2660_s2 }
0x1fb1   :  { %v1427_v41 = vpop.permute.xlu1 %1426 }
0x1fb2   :  { %2347 = vmatmul.mubr.msk.f32.vlgmr.msra.gmra.mrb[12].mxu1 %vm156_vm4, %v1427_v41 }
0x1fb3   :  { %2494 = vmatpush3.bf16.msra.mxu1 %v2904_v29  ;;  %2368 = vmatprep.mubr.msk.f32.mxu1 %vm2658_vm0, %v2657_v9 }
0x1fb4   :  { %2495 = vmatprep.subr.bf16.mxu1 %v2656_v2 }
0x1fb7   :  { %2497 = vmatpush3.bf16.msra.mxu1 %v2910_v31 }
0x1fb8   :  { %2504 = vmatprep.subr.bf16.mxu1 %v2656_v2 }
0x2085   :  { %v1496_v42 = vpop.f32.mrb[12].mxu1 }
0x2086   :  { %v1501_v43 = vrot.slane %v1496_v42, 2  ;;  %v2348_v46 = vpop.f32.mrb[13].mxu1 }
0x2088   :  { %v1503_v47 = vadd.f32 %v1501_v43, %v2936_v40 }
0x208a   :  { %2615 = vtanh.f32 %v1503_v47  ;;  %v2103_v49 = vmul.f32 -1.442695, %v1503_v47 }
0x208c   :  { %2617 = vpow2.f32 %v2103_v49 }
0x2094   :  { %v2616_v48 = vpop.eup %2615 }
0x2095   :  { %1516 = vrot.lane.b32.xlu0 %v2616_v48, %s2659_s27 }
0x2096   :  { %v2618_v22 = vpop.eup %2617 }
0x2097   :  { %v1507_v24 = vadd.f32 1.0, %v2618_v22 }
0x2099   :  { %2619 = vrcp.f32 %v1507_v24 }
0x20a3   :  { %v2620_v50 = vpop.eup %2619 }
0x20a4   :  { %v1514_v52 = vmul.f32 %v2620_v50, %v1512_v51 }
0x2107   :  { %v1517_v28 = vpop.permute.xlu0 %1516 }
0x2108   :  { %v1519_v27 = vmul.f32 %v2620_v50, %v1517_v28 }
0x210a   :  { %1521 = vrot.lane.b32.xlu1 %v1519_v27, %s2660_s2 }
0x217c   :  { %v1522_v53 = vpop.permute.xlu1 %1521 }
0x217d   :  { %v1524_v54 = vadd.f32 %v1522_v53, %v1514_v52 }
0x217f   :  { %2621 = vtanh.f32 %v1524_v54  ;;  %v1621_v45 = vrot.slane %v1524_v54, 6 }
0x2189   :  { %v2622_v40 = vpop.eup %2621 }
0x218a   :  { %1527 = vrot.lane.b32.xlu0 %v2622_v40, %s2659_s27 }
0x21fc   :  { %v1528_v56 = vpop.permute.xlu0 %1527 }
0x21fd   :  { %v2985_v57 = vmul.f32 %v2620_v50, %v1528_v56 }
0x21ff   :  { %v1537_v58 = vrot.slane %v2985_v57, 6 }
0x2201   :  { %1538 = vrot.lane.b32.xlu1 %v1537_v58, %s2660_s2 }
0x2273   :  { %v1539_v59 = vpop.permute.xlu1 %1538 }
0x2274   :  { %2358 = vmatmul.mubr.msk.f32.vlgmr.msra.gmra.mrb[16].mxu0 %vm156_vm4, %v1539_v59 }
0x2275   :  { %2500 = vmatpush3.bf16.msra.mxu0 %v2904_v29  ;;  %2379 = vmatprep.mubr.msk.f32.mxu0 %vm2658_vm0, %v2657_v9 }
0x2276   :  { %2501 = vmatprep.subr.bf16.mxu0 %v2656_v2 }
0x2279   :  { %2503 = vmatpush3.bf16.msra.mxu0 %v2910_v31 }
0x2347   :  { %v1608_v61 = vpop.f32.mrb[16].mxu0 }
0x2348   :  { %v1612_v62 = vadd.f32 %v1608_v61, %v2997_v60  ;;  %v2359_v63 = vpop.f32.mrb[17].mxu0 }
0x234a   :  { %2623 = vtanh.f32 %v1612_v62  ;;  %v2105_v1 = vmul.f32 -1.442695, %v1612_v62 }
0x234c   :  { %2625 = vpow2.f32 %v2105_v1 }
0x2354   :  { %v2624_v0 = vpop.eup %2623 }
0x2355   :  { %1625 = vrot.lane.b32.xlu0 %v2624_v0, %s2659_s27 }
0x2356   :  { %v2626_v25 = vpop.eup %2625 }
0x2357   :  { %v1616_v44 = vadd.f32 1.0, %v2626_v25 }
0x2359   :  { %2627 = vrcp.f32 %v1616_v44 }
0x2363   :  { %v2628_v3 = vpop.eup %2627 }
0x2364   :  { %v1623_v39 = vmul.f32 %v2628_v3, %v1621_v45 }
0x23c7   :  { %v1626_v4 = vpop.permute.xlu0 %1625 }
0x23c8   :  { %v1628_v6 = vmul.f32 %v2628_v3, %v1626_v4 }
0x23ca   :  { %1630 = vrot.lane.b32.xlu1 %v1628_v6, %s2660_s2 }
0x243c   :  { %v1631_v7 = vpop.permute.xlu1 %1630 }
0x243d   :  { %v1633_v55 = vadd.f32 %v1631_v7, %v1623_v39 }
0x243f   :  { %2629 = vtanh.f32 %v1633_v55 }
0x2449   :  { %v2630_v8 = vpop.eup %2629 }
0x244a   :  { %1636 = vrot.lane.b32.xlu0 %v2630_v8, %s2659_s27 }
0x24bc   :  { %v1637_v10 = vpop.permute.xlu0 %1636 }
0x24bd   :  { %v1639_v12 = vmul.f32 %v2628_v3, %v1637_v10  ;;  %v1978_v10 = vld [vmem:[%s3078_s7 + $0x8] sm:$0xff] }
0x24bf   :  { %1641 = vrot.lane.b32.xlu1 %v1639_v12, %s2660_s2 }
0x2531   :  { %v1642_v13 = vpop.permute.xlu1 %1641 }
0x2532   :  { %1644 = vst.msk [vmem:[#allocation2 + $0x8] sm:$0x3] %vm1202_vm6, %v1642_v13  ;;  %2369 = vmatmul.mubr.msk.f32.vlgmr.msra.gmra.mrb[14].mxu1 %vm156_vm4, %v1642_v13  ;;  %v1979_v13 = vld [vmem:[%s3078_s7 + $0x10] sm:$0xff] }
0x2533   :  { %2506 = vmatpush3.bf16.msra.mxu1 %v2904_v29  ;;  %2390 = vmatprep.mubr.msk.f32.mxu1 %vm2658_vm0, %v2657_v9 }
0x2534   :  { %2507 = vmatprep.subr.bf16.mxu1 %v2656_v2  ;;  %v1729_v2 = vrot.slane %v1633_v55, 6 }
0x2537   :  { %2509 = vmatpush3.bf16.msra.mxu1 %v2910_v31 }
0x2605   :  { %v1713_v14 = vpop.f32.mrb[14].mxu1 }
0x2606   :  { %v1718_v16 = vrot.slane %v1713_v14, 6  ;;  %v2370_v17 = vpop.f32.mrb[15].mxu1 }
0x2608   :  { %v1720_v5 = vadd.f32 %v1718_v16, %v2997_v60 }
0x260a   :  { %2631 = vtanh.f32 %v1720_v5  ;;  %v2107_v19 = vmul.f32 -1.442695, %v1720_v5 }
0x260c   :  { %2633 = vpow2.f32 %v2107_v19 }
0x2614   :  { %v2632_v18 = vpop.eup %2631 }
0x2615   :  { %1733 = vrot.lane.b32.xlu0 %v2632_v18, %s2659_s27 }
0x2616   :  { %v2634_v20 = vpop.eup %2633 }
0x2617   :  { %v1724_v29 = vadd.f32 1.0, %v2634_v20 }
0x2619   :  { %2635 = vrcp.f32 %v1724_v29 }
0x2623   :  { %v2636_v21 = vpop.eup %2635 }
0x2624   :  { %v1731_v31 = vmul.f32 %v2636_v21, %v1729_v2 }
0x2687   :  { %v1734_v9 = vpop.permute.xlu0 %1733 }
0x2688   :  { %v1736_v15 = vmul.f32 %v2636_v21, %v1734_v9 }
0x268a   :  { %1738 = vrot.lane.b32.xlu1 %v1736_v15, %s2660_s2 }
0x26fc   :  { %v1739_v23 = vpop.permute.xlu1 %1738 }
0x26fd   :  { %v1741_v26 = vadd.f32 %v1739_v23, %v1731_v31 }
0x26ff   :  { %2637 = vtanh.f32 %v1741_v26  ;;  %v1840_v50 = vrot.slane %v1741_v26, 6 }
0x2709   :  { %v2638_v30 = vpop.eup %2637 }
0x270a   :  { %1744 = vrot.lane.b32.xlu0 %v2638_v30, %s2659_s27 }
0x277c   :  { %v1745_v32 = vpop.permute.xlu0 %1744 }
0x277d   :  { %v3015_v33 = vmul.f32 %v2636_v21, %v1745_v32  ;;  %v2112_v21 = vld [vmem:[%s3079_s8] ss:$0 sm:$0xff] }
0x277f   :  { %v1753_v34 = vrot.slane %v3015_v33, 2 }
0x2781   :  { %1754 = vrot.lane.b32.xlu1 %v1753_v34, %s2660_s2 }
0x27f3   :  { %v1755_v35 = vpop.permute.xlu1 %1754 }
0x27f4   :  { %2380 = vmatmul.mubr.msk.f32.vlgmr.msra.gmra.mrb[18].mxu0 %vm156_vm4, %v1755_v35 }
0x28c7   :  { %v1824_v36 = vpop.f32.mrb[18].mxu0 }
0x28c8   :  { %v1829_v38 = vrot.slane %v1824_v36, 4  ;;  %v2381_v41 = vpop.f32.mrb[19].mxu0 }
0x28ca   :  { %v1831_v42 = vadd.f32 %v1829_v38, %v2997_v60 }
0x28cc   :  { %2639 = vtanh.f32 %v1831_v42  ;;  %v2109_v46 = vmul.f32 -1.442695, %v1831_v42 }
0x28ce   :  { %2641 = vpow2.f32 %v2109_v46 }
0x28d6   :  { %v2640_v43 = vpop.eup %2639 }
0x28d7   :  { %1844 = vrot.lane.b32.xlu0 %v2640_v43, %s2659_s27 }
0x28d8   :  { %v2642_v47 = vpop.eup %2641 }
0x28d9   :  { %v1835_v48 = vadd.f32 1.0, %v2642_v47 }
0x28db   :  { %2643 = vrcp.f32 %v1835_v48 }
0x28e5   :  { %v2644_v49 = vpop.eup %2643 }
0x28e6   :  { %v1842_v28 = vmul.f32 %v2644_v49, %v1840_v50 }
0x2949   :  { %v1845_v22 = vpop.permute.xlu0 %1844 }
0x294a   :  { %v1847_v24 = vmul.f32 %v2644_v49, %v1845_v22 }
0x294c   :  { %1849 = vrot.lane.b32.xlu1 %v1847_v24, %s2660_s2 }
0x29be   :  { %v1850_v27 = vpop.permute.xlu1 %1849 }
0x29bf   :  { %v1852_v51 = vadd.f32 %v1850_v27, %v1842_v28 }
0x29c1   :  { %2645 = vtanh.f32 %v1852_v51 }
0x29cb   :  { %v2646_v52 = vpop.eup %2645 }
0x29cc   :  { %1855 = vrot.lane.b32.xlu0 %v2646_v52, %s2659_s27 }
0x2a3e   :  { %v1856_v53 = vpop.permute.xlu0 %1855 }
0x2a3f   :  { %v1858_v54 = vmul.f32 %v2644_v49, %v1856_v53 }
0x2a41   :  { %v1864_v40 = vrot.slane %v1858_v54, 4 }
0x2a43   :  { %1865 = vrot.lane.b32.xlu1 %v1864_v40, %s2660_s2 }
0x2ab5   :  { %v1866_v56 = vpop.permute.xlu1 %1865 }
0x2ab6   :  { %2391 = vmatmul.mubr.msk.f32.vlgmr.msra.gmra.mrb[16].mxu1 %vm156_vm4, %v1866_v56 }
0x2b89   :  { %v1935_v58 = vpop.f32.mrb[16].mxu1 }
0x2b8a   :  { %v1940_v59 = vrot.slane %v1935_v58, 2  ;;  %v2392_v61 = vpop.f32.mrb[17].mxu1 }
0x2b8c   :  { %v1942_v62 = vadd.f32 %v1940_v59, %v2997_v60  ;;  %v1951_v60 = vrot.slane %v1852_v51, 6 }
0x2b8e   :  { %2647 = vtanh.f32 %v1942_v62  ;;  %v2111_v0 = vmul.f32 -1.442695, %v1942_v62 }
0x2b90   :  { %2649 = vpow2.f32 %v2111_v0 }
0x2b98   :  { %v2648_v63 = vpop.eup %2647 }
0x2b99   :  { %1955 = vrot.lane.b32.xlu0 %v2648_v63, %s2659_s27 }
0x2b9a   :  { %v2650_v1 = vpop.eup %2649 }
0x2b9b   :  { %v1946_v25 = vadd.f32 1.0, %v2650_v1 }
0x2b9d   :  { %2651 = vrcp.f32 %v1946_v25 }
0x2ba7   :  { %v2652_v44 = vpop.eup %2651 }
0x2ba8   :  { %v1953_v6 = vmul.f32 %v2652_v44, %v1951_v60 }
0x2c0b   :  { %v1956_v3 = vpop.permute.xlu0 %1955 }
0x2c0c   :  { %v1958_v4 = vmul.f32 %v2652_v44, %v1956_v3 }
0x2c0e   :  { %1960 = vrot.lane.b32.xlu1 %v1958_v4, %s2660_s2 }
0x2c12   :  { %1308 = vrot.lane.b32.xlu1 %v2955_v11, %s2660_s2 }
0x2c16   :  { %1532 = vrot.lane.b32.xlu1 %v2985_v57, %s2660_s2  ;;  %v1977_v57 = vld [vmem:[%s3078_s7] sm:$0xff] }
0x2c17   :  { %v2510_v12 = vpack.c.bf16 %v1978_v10, %v1977_v57 }
0x2c19   :  { %2511 = vmatprep.subr.bf16.mxu0 %v2510_v12 }
0x2c1a   :  { %1860 = vrot.lane.b32.xlu1 %v1858_v54, %s2660_s2  ;;  %2513 = vmatpush3.bf16.msra.mxu0 %v2510_v12 }
0x2c80   :  { %v1961_v45 = vpop.permute.xlu1 %1960 }
0x2c81   :  { %v1963_v39 = vadd.f32 %v1961_v45, %v1953_v6 }
0x2c83   :  { %2653 = vtanh.f32 %v1963_v39 }
0x2c84   :  { %v1309_v7 = vpop.permute.xlu1 %1308 }
0x2c85   :  { %1312 = vst.msk [vmem:[#allocation2] sm:$0xc] %vm1311_vm7, %v1309_v7 }
0x2c88   :  { %v1533_v55 = vpop.permute.xlu1 %1532 }
0x2c89   :  { %1536 = vst.msk [vmem:[#allocation2] sm:$0xc0] %vm1535_vm8, %v1533_v55 }
0x2c8c   :  { %v1861_v11 = vpop.permute.xlu1 %1860 }
0x2c8d   :  { %v2654_v8 = vpop.eup %2653  ;;  %1863 = vst.msk [vmem:[#allocation2 + $0x8] sm:$0x30] %vm1423_vm9, %v1861_v11 }
0x2c8e   :  { %1966 = vrot.lane.b32.xlu0 %v2654_v8, %s2659_s27 }
0x2c92   :  { %1420 = vrot.lane.b32.xlu0 %v2970_v37, %s2660_s2  ;;  %v1980_v37 = vld [vmem:[%s3078_s7 + $0x18] sm:$0xff] }
0x2c93   :  { %v2514_v14 = vpack.c.bf16 %v1980_v37, %v1979_v13 }
0x2c95   :  { %2515 = vmatprep.subr.bf16.mxu0 %v2514_v14 }
0x2c96   :  { %1749 = vrot.lane.b32.xlu0 %v3015_v33, %s2660_s2  ;;  %2517 = vmatpush3.bf16.msra.mxu0 %v2514_v14 }
0x2d00   :  { %v1967_v16 = vpop.permute.xlu0 %1966 }
0x2d01   :  { %v1969_v17 = vmul.f32 %v2652_v44, %v1967_v16 }
0x2d03   :  { %1971 = vrot.lane.b32.xlu0 %v1969_v17, %s2660_s2 }
0x2d04   :  { %v1421_v5 = vpop.permute.xlu0 %1420 }
0x2d05   :  { %1424 = vst.msk [vmem:[#allocation2] sm:$0x30] %vm1423_vm9, %v1421_v5 }
0x2d08   :  { %v1750_v18 = vpop.permute.xlu0 %1749 }
0x2d09   :  { %1752 = vst.msk [vmem:[#allocation2 + $0x8] sm:$0xc] %vm1311_vm7, %v1750_v18 }
0x2d0c   :  { %v1975_v19 = vld [vmem:[#allocation2] sm:$0xff] }
0x2d0d   :  { %2401 = vmatprep.mubr.msk.f32.mxu0 %vm156_vm4, %v1975_v19 }
0x2d75   :  { %v1972_v20 = vpop.permute.xlu0 %1971 }
0x2d76   :  { %1974 = vst.msk [vmem:[#allocation2 + $0x8] sm:$0xc0] %vm1535_vm8, %v1972_v20 }
0x2d7d   :  { %v1976_v29 = vld [vmem:[#allocation2 + $0x8] sm:$0xff] }
0x2d7e   :  { %2402 = vmatmul.mubr.msk.f32.vlgmr.msra.gmra.mrb[20].mxu0 %vm156_vm4, %v1976_v29 }
0x2e51   :  { %v2403_v9 = vpop.f32.mrb[20].mxu0 }
0x2e52   :  { %v2066_v15 = vadd.f32 %v2403_v9, %v2112_v21  ;;  %v2060_v2 = vpop.f32.mrb[21].mxu0 }
0x2e53   :  { %v2061_v31 = vadd.f32 %v2112_v21, %v2060_v2 }
0x2e54   :  { %2070 = vst.msk [vmem:[%s3080_s9 + $0x8] sm:$0xff] %vm64_vm1, %v2066_v15 }
0x2e55   :  { %2069 = vst.msk [vmem:[%s3080_s9] sm:$0xff] %vm64_vm1, %v2061_v31 }

</bundles_post_ra>
